<compile_context>
chip_gen: v5e
topology: v5e:2x2
jax: 0.10.0
libtpu: 0.0.40
codegen_flags: <defaults>
</compile_context>

<pallas_src>
import jax
import jax.numpy as jnp
from jax.experimental import pallas as pl
from jax.experimental.pallas import tpu as pltpu


# ----------------------------------------------------------------------------
# GRU gate math (PyTorch equations, r/z/n gate order). gi/gh already include
# their respective biases; gh_n carries b_hn so it sits inside the r* term.
# ----------------------------------------------------------------------------
def _gru_gates(gi, gh, h_prev, H):
    r = jax.nn.sigmoid(gi[:, 0:H] + gh[:, 0:H])
    z = jax.nn.sigmoid(gi[:, H:2 * H] + gh[:, H:2 * H])
    n = jnp.tanh(gi[:, 2 * H:3 * H] + r * gh[:, 2 * H:3 * H])
    return (1.0 - z) * n + z * h_prev


# ----------------------------------------------------------------------------
# Fully fused forward: one pallas_call for conv1 -> conv2 -> biGRU stack -> head
# ----------------------------------------------------------------------------
def forward(params, x, seq_lens):
    # x: (B, 68, T) float32, seq_lens: (B,) float  ->  probs (B, n_cls) float32
    B, C_in, T = x.shape
    w1, b1, w2, b2 = params["w1"], params["b1"], params["w2"], params["b2"]
    gru = params["gru"]
    wc1, bc1, wc2, bc2 = params["wc1"], params["bc1"], params["wc2"], params["bc2"]

    H = gru[0]["whh"].shape[0] // 2          # hidden size per direction
    n_cls = wc2.shape[-1]
    n_layers = len(gru)

    K, S = 3, 2                              # conv kernel / stride
    L1 = (T - K) // S + 1                    # conv1 output length
    L2 = (L1 - K) // S + 1                   # conv2 output length == GRU time steps
    assert L2 >= 1, "sequence too short for the two stride-2 convolutions"

    # --- host-side layout prep (cheap XLA): channel-last stride-2 taps, flattened
    #     time-major / batch-minor (rows = t*B + b), cast to bf16 for the MXU.
    x_cl = jnp.transpose(x, (0, 2, 1))                         # (B, T, C_in)
    taps = []
    for k in range(K):
        t_k = x_cl[:, k:k + S * (L1 - 1) + 1:S, :]             # (B, L1, C_in)
        taps.append(jnp.transpose(t_k, (1, 0, 2))
                    .reshape(L1 * B, C_in).astype(jnp.bfloat16))
    inv_len = (1.0 / seq_lens.astype(jnp.float32)).reshape(B, 1)

    inputs = [*taps, inv_len, w1, b1, w2, b2]
    for lyr in gru:
        inputs += [lyr["wih"], lyr["bih"], lyr["whh"], lyr["bhh"]]
    inputs += [wc1, bc1, wc2, bc2]

    def kernel(*refs):
        (t0_ref, t1_ref, t2_ref, invlen_ref,
         w1_ref, b1_ref, w2_ref, b2_ref) = refs[:8]
        gru_refs = refs[8:8 + 4 * n_layers]
        wc1_ref, bc1_ref, wc2_ref, bc2_ref, o_ref = refs[8 + 4 * n_layers:]

        f32, bf16 = jnp.float32, jnp.bfloat16

        def mm(a, w):                                           # bf16 MXU, f32 accumulate
            return jnp.dot(a.astype(bf16), w, preferred_element_type=f32)

        # ---- conv1 (k=3, s=2) + ReLU: one matmul per tap over all B*L1 frames
        y1 = (mm(t0_ref[...], w1_ref[0]) + mm(t1_ref[...], w1_ref[1])
              + mm(t2_ref[...], w1_ref[2]) + b1_ref[...])
        y1 = jax.nn.relu(y1)                                    # (L1*B, C1), rows = t*B + b

        # ---- conv2 (k=3, s=2) + ReLU: K full-sequence tap matmuls over all L1 frames,
        #      then per-output-frame sums of contiguous static row-blocks (no strided access).
        g = [mm(y1, w2_ref[k]) for k in range(K)]               # K x (L1*B, D)
        frames = []                                             # list of (B, D), time-major
        for t in range(L2):
            acc = b2_ref[...]
            for k in range(K):
                row0 = (S * t + k) * B
                acc = acc + g[k][row0:row0 + B, :]
            frames.append(jax.nn.relu(acc))
        seq_flat = jnp.concatenate(frames, axis=0)              # (L2*B, D), rows = t*B + b

        # ---- stacked bidirectional GRU, both directions fused per layer
        for l in range(n_layers):
            wih_ref, bih_ref, whh_ref, bhh_ref = gru_refs[4 * l:4 * l + 4]
            # hoisted input projection: one matmul for all timesteps & both directions
            gx = mm(seq_flat, wih_ref[...]) + bih_ref[...]      # (L2*B, 6H) [fwd r|z|n, bwd r|z|n]
            h_cat = jnp.zeros((B, 2 * H), f32)                  # [h_fwd | h_bwd]
            h_f_steps, h_b_steps = [], []
            for s in range(L2):
                # single fused recurrent matmul (block-diagonal W_hh covers both directions)
                gh = mm(h_cat, whh_ref[...]) + bhh_ref[...]     # (B, 6H)
                gi_f = gx[s * B:(s + 1) * B, 0:3 * H]                       # fwd reads time s
                gi_b = gx[(L2 - 1 - s) * B:(L2 - s) * B, 3 * H:6 * H]       # bwd reads time L2-1-s
                h_f = _gru_gates(gi_f, gh[:, 0:3 * H], h_cat[:, 0:H], H)
                h_b = _gru_gates(gi_b, gh[:, 3 * H:6 * H], h_cat[:, H:2 * H], H)
                h_cat = jnp.concatenate([h_f, h_b], axis=1)
                h_f_steps.append(h_f)
                h_b_steps.append(h_b)
            # output at time t = [fwd hidden at t | bwd hidden at t]; bwd step s covers time L2-1-s
            fwd_all = jnp.concatenate(h_f_steps, axis=0)                  # (L2*B, H)
            bwd_all = jnp.concatenate(h_b_steps[::-1], axis=0)            # (L2*B, H), time-ordered
            seq_flat = jnp.concatenate([fwd_all, bwd_all], axis=1)        # (L2*B, 2H)

        # ---- head (fused epilogue): sum over time / seq_len -> Linear/Tanh/Linear/Sigmoid
        pooled = seq_flat[0:B, :]
        for t in range(1, L2):
            pooled = pooled + seq_flat[t * B:(t + 1) * B, :]
        pooled = pooled * invlen_ref[...]                       # (B, 2H) * (B, 1)
        hid = jnp.tanh(mm(pooled, wc1_ref[...]) + bc1_ref[...])
        logits = mm(hid, wc2_ref[...]) + bc2_ref[...]
        o_ref[...] = jax.nn.sigmoid(logits)

    vmem = pl.BlockSpec(memory_space=pltpu.MemorySpace.VMEM)
    return pl.pallas_call(
        kernel,
        out_shape=jax.ShapeDtypeStruct((B, n_cls), jnp.float32),
        in_specs=[vmem] * len(inputs),
        out_specs=vmem,
    )(*inputs)


# ----------------------------------------------------------------------------
# Synthetic parameters, stored directly in the fused kernel layouts:
#   conv weights as (k, Cin, Cout) per-tap matrices (bf16),
#   GRU W_ih as (I, 6H) [fwd r|z|n | bwd r|z|n], W_hh as block-diag (2H, 6H),
#   biases f32.
# ----------------------------------------------------------------------------
def init_params(key, input_dim, out_dim, n_gru_layers, n_cls):
    H = out_dim // 2
    c1 = out_dim // 4
    keys = iter(jax.random.split(key, 128))
    bf = jnp.bfloat16

    def rnd(shape, scale=0.1, dtype=jnp.float32):
        return (scale * jax.random.normal(next(keys), shape, dtype=jnp.float32)).astype(dtype)

    p = {
        "w1": rnd((3, input_dim, c1), dtype=bf),
        "b1": rnd((1, c1)),
        "w2": rnd((3, c1, out_dim), dtype=bf),
        "b2": rnd((1, out_dim)),
    }
    gru = []
    in_sz = out_dim
    for _ in range(n_gru_layers):
        wih = rnd((in_sz, 6 * H), dtype=bf)
        bih = rnd((1, 6 * H))
        whh_f = rnd((H, 3 * H))
        whh_b = rnd((H, 3 * H))
        whh = jnp.zeros((2 * H, 6 * H), jnp.float32)
        whh = whh.at[:H, :3 * H].set(whh_f).at[H:, 3 * H:].set(whh_b)
        gru.append({"wih": wih, "bih": bih, "whh": whh.astype(bf), "bhh": rnd((1, 6 * H))})
        in_sz = 2 * H
    p["gru"] = gru
    p["wc1"] = rnd((out_dim, out_dim // 4), dtype=bf)
    p["bc1"] = rnd((1, out_dim // 4))
    p["wc2"] = rnd((out_dim // 4, n_cls), dtype=bf)
    p["bc2"] = rnd((1, n_cls))
    return p


# ----------------------------------------------------------------------------
# Plain-JAX reference (mirrors the PyTorch module structure; extracts the
# per-direction GRU weights back out of the fused layouts) for a sanity check.
# ----------------------------------------------------------------------------
def reference_forward(params, x, seq_lens):
    bf = jnp.bfloat16
    B, _, _ = x.shape
    H = params["gru"][0]["whh"].shape[0] // 2

    def conv(xc, w, b, K=3, S=2):
        L = (xc.shape[1] - K) // S + 1
        outs = []
        for t in range(L):
            acc = b[0]
            for k in range(K):
                acc = acc + jnp.dot(xc[:, S * t + k, :].astype(bf), w[k],
                                    preferred_element_type=jnp.float32)
            outs.append(jax.nn.relu(acc))
        return jnp.stack(outs, axis=1)                          # (B, L, Cout)

    xc = jnp.transpose(x, (0, 2, 1))
    y1 = conv(xc, params["w1"], params["b1"])
    y2 = conv(y1, params["w2"], params["b2"])
    seq = jnp.transpose(y2, (1, 0, 2))                          # (T2, B, D)

    def gru_dir(s, wih, whh, bih, bhh, reverse):
        Tn, Bn, _ = s.shape
        h = jnp.zeros((Bn, H), jnp.float32)
        outs = [None] * Tn
        order = range(Tn - 1, -1, -1) if reverse else range(Tn)
        for t in order:
            gi = jnp.dot(s[t].astype(bf), wih, preferred_element_type=jnp.float32) + bih
            gh = jnp.dot(h.astype(bf), whh, preferred_element_type=jnp.float32) + bhh
            r = jax.nn.sigmoid(gi[:, :H] + gh[:, :H])
            z = jax.nn.sigmoid(gi[:, H:2 * H] + gh[:, H:2 * H])
            n = jnp.tanh(gi[:, 2 * H:] + r * gh[:, 2 * H:])
            h = (1.0 - z) * n + z * h
            outs[t] = h
        return jnp.stack(outs, axis=0)

    for lyr in params["gru"]:
        wih, bih, whh, bhh = lyr["wih"], lyr["bih"], lyr["whh"], lyr["bhh"]
        fwd = gru_dir(seq, wih[:, :3 * H], whh[:H, :3 * H],
                      bih[:, :3 * H], bhh[:, :3 * H], reverse=False)
        bwd = gru_dir(seq, wih[:, 3 * H:], whh[H:, 3 * H:],
                      bih[:, 3 * H:], bhh[:, 3 * H:], reverse=True)
        seq = jnp.concatenate([fwd, bwd], axis=-1)

    pooled = jnp.sum(seq, axis=0) / seq_lens.reshape(B, 1)
    hid = jnp.tanh(jnp.dot(pooled.astype(bf), params["wc1"],
                           preferred_element_type=jnp.float32) + params["bc1"])
    logits = jnp.dot(hid.astype(bf), params["wc2"],
                     preferred_element_type=jnp.float32) + params["bc2"]
    return jax.nn.sigmoid(logits)


if __name__ == "__main__":
    B, input_dim, T = 2, 68, 16
    out_dim, n_gru_layers, n_cls = 32, 2, 5     # args.out_dim=32, args.n_gru_layers=2, interview=False

    key = jax.random.PRNGKey(0)
    kx, kp = jax.random.split(key)
    x = jax.random.normal(kx, (B, input_dim, T), dtype=jnp.float32)
    seq_lens = jnp.array([16.0, 13.0], dtype=jnp.float32)

    params = init_params(kp, input_dim, out_dim, n_gru_layers, n_cls)

    fwd = jax.jit(forward)
    probs = jax.block_until_ready(fwd(params, x, seq_lens))

    assert probs.shape == (B, n_cls), probs.shape
    assert bool(jnp.all(jnp.isfinite(probs)))
    assert bool(jnp.all((probs >= 0.0) & (probs <= 1.0)))

    ref = jax.block_until_ready(reference_forward(params, x, seq_lens))
    max_err = float(jnp.max(jnp.abs(probs - ref)))
    assert max_err < 1e-2, f"kernel vs reference mismatch: {max_err}"

    print("KERNEL_OK")
</pallas_src>

<mosaic_0001>
module attributes {stable_mosaic.version = 11 : i64} {
  func.func @kernel(%arg0: memref<14x68xbf16, #tpu.memory_space<vmem>>, %arg1: memref<14x68xbf16, #tpu.memory_space<vmem>>, %arg2: memref<14x68xbf16, #tpu.memory_space<vmem>>, %arg3: memref<2x1xf32, #tpu.memory_space<vmem>>, %arg4: memref<3x68x8xbf16, #tpu.memory_space<vmem>>, %arg5: memref<1x8xf32, #tpu.memory_space<vmem>>, %arg6: memref<3x8x32xbf16, #tpu.memory_space<vmem>>, %arg7: memref<1x32xf32, #tpu.memory_space<vmem>>, %arg8: memref<32x96xbf16, #tpu.memory_space<vmem>>, %arg9: memref<1x96xf32, #tpu.memory_space<vmem>>, %arg10: memref<32x96xbf16, #tpu.memory_space<vmem>>, %arg11: memref<1x96xf32, #tpu.memory_space<vmem>>, %arg12: memref<32x96xbf16, #tpu.memory_space<vmem>>, %arg13: memref<1x96xf32, #tpu.memory_space<vmem>>, %arg14: memref<32x96xbf16, #tpu.memory_space<vmem>>, %arg15: memref<1x96xf32, #tpu.memory_space<vmem>>, %arg16: memref<32x8xbf16, #tpu.memory_space<vmem>>, %arg17: memref<1x8xf32, #tpu.memory_space<vmem>>, %arg18: memref<8x5xbf16, #tpu.memory_space<vmem>>, %arg19: memref<1x5xf32, #tpu.memory_space<vmem>>, %arg20: memref<2x5xf32, #tpu.memory_space<vmem>>) attributes {dimension_semantics = [], scalar_prefetch = 0 : i64, scratch_operands = 0 : i64, tpu.core_type = #tpu.core_type<tc>} {
    %c0 = arith.constant 0 : index
    %c0_0 = arith.constant 0 : index
    %0 = vector.load %arg0[%c0, %c0_0] : memref<14x68xbf16, #tpu.memory_space<vmem>>, vector<14x68xbf16>
    %c0_1 = arith.constant 0 : index
    %c0_2 = arith.constant 0 : index
    %c0_3 = arith.constant 0 : index
    %1 = vector.load %arg4[%c0_1, %c0_2, %c0_3] : memref<3x68x8xbf16, #tpu.memory_space<vmem>>, vector<1x68x8xbf16>
    %2 = vector.shape_cast %1 : vector<1x68x8xbf16> to vector<68x8xbf16>
    %cst = arith.constant dense<0.000000e+00> : vector<14x8xf32>
    %3 = tpu.matmul %0, %2, %cst {dimension_numbers = #tpu.dot_dimension_numbers<[1], [0], [0], [1], [0, 0, 1, 1], [], []>} : vector<14x68xbf16>, vector<68x8xbf16>, vector<14x8xf32> -> vector<14x8xf32>
    %c0_4 = arith.constant 0 : index
    %c0_5 = arith.constant 0 : index
    %4 = vector.load %arg1[%c0_4, %c0_5] : memref<14x68xbf16, #tpu.memory_space<vmem>>, vector<14x68xbf16>
    %c1 = arith.constant 1 : index
    %c0_6 = arith.constant 0 : index
    %c0_7 = arith.constant 0 : index
    %5 = vector.load %arg4[%c1, %c0_6, %c0_7] : memref<3x68x8xbf16, #tpu.memory_space<vmem>>, vector<1x68x8xbf16>
    %6 = vector.shape_cast %5 : vector<1x68x8xbf16> to vector<68x8xbf16>
    %cst_8 = arith.constant dense<0.000000e+00> : vector<14x8xf32>
    %7 = tpu.matmul %4, %6, %cst_8 {dimension_numbers = #tpu.dot_dimension_numbers<[1], [0], [0], [1], [0, 0, 1, 1], [], []>} : vector<14x68xbf16>, vector<68x8xbf16>, vector<14x8xf32> -> vector<14x8xf32>
    %8 = arith.addf %3, %7 : vector<14x8xf32>
    %c0_9 = arith.constant 0 : index
    %c0_10 = arith.constant 0 : index
    %9 = vector.load %arg2[%c0_9, %c0_10] : memref<14x68xbf16, #tpu.memory_space<vmem>>, vector<14x68xbf16>
    %c2 = arith.constant 2 : index
    %c0_11 = arith.constant 0 : index
    %c0_12 = arith.constant 0 : index
    %10 = vector.load %arg4[%c2, %c0_11, %c0_12] : memref<3x68x8xbf16, #tpu.memory_space<vmem>>, vector<1x68x8xbf16>
    %11 = vector.shape_cast %10 : vector<1x68x8xbf16> to vector<68x8xbf16>
    %cst_13 = arith.constant dense<0.000000e+00> : vector<14x8xf32>
    %12 = tpu.matmul %9, %11, %cst_13 {dimension_numbers = #tpu.dot_dimension_numbers<[1], [0], [0], [1], [0, 0, 1, 1], [], []>} : vector<14x68xbf16>, vector<68x8xbf16>, vector<14x8xf32> -> vector<14x8xf32>
    %13 = arith.addf %8, %12 : vector<14x8xf32>
    %c0_14 = arith.constant 0 : index
    %c0_15 = arith.constant 0 : index
    %14 = vector.load %arg5[%c0_14, %c0_15] : memref<1x8xf32, #tpu.memory_space<vmem>>, vector<1x8xf32>
    %15 = vector.broadcast %14 : vector<1x8xf32> to vector<14x8xf32>
    %16 = arith.addf %13, %15 : vector<14x8xf32>
    %cst_16 = arith.constant 0.000000e+00 : f32
    %17 = vector.broadcast %cst_16 : f32 to vector<14x8xf32>
    %18 = arith.maximumf %16, %17 : vector<14x8xf32>
    %c0_17 = arith.constant 0 : index
    %c0_18 = arith.constant 0 : index
    %c0_19 = arith.constant 0 : index
    %19 = vector.load %arg6[%c0_17, %c0_18, %c0_19] : memref<3x8x32xbf16, #tpu.memory_space<vmem>>, vector<1x8x32xbf16>
    %20 = vector.shape_cast %19 : vector<1x8x32xbf16> to vector<8x32xbf16>
    %21 = arith.truncf %18 : vector<14x8xf32> to vector<14x8xbf16>
    %cst_20 = arith.constant dense<0.000000e+00> : vector<14x32xf32>
    %22 = tpu.matmul %21, %20, %cst_20 {dimension_numbers = #tpu.dot_dimension_numbers<[1], [0], [0], [1], [0, 0, 1, 1], [], []>} : vector<14x8xbf16>, vector<8x32xbf16>, vector<14x32xf32> -> vector<14x32xf32>
    %c1_21 = arith.constant 1 : index
    %c0_22 = arith.constant 0 : index
    %c0_23 = arith.constant 0 : index
    %23 = vector.load %arg6[%c1_21, %c0_22, %c0_23] : memref<3x8x32xbf16, #tpu.memory_space<vmem>>, vector<1x8x32xbf16>
    %24 = vector.shape_cast %23 : vector<1x8x32xbf16> to vector<8x32xbf16>
    %25 = arith.truncf %18 : vector<14x8xf32> to vector<14x8xbf16>
    %cst_24 = arith.constant dense<0.000000e+00> : vector<14x32xf32>
    %26 = tpu.matmul %25, %24, %cst_24 {dimension_numbers = #tpu.dot_dimension_numbers<[1], [0], [0], [1], [0, 0, 1, 1], [], []>} : vector<14x8xbf16>, vector<8x32xbf16>, vector<14x32xf32> -> vector<14x32xf32>
    %c2_25 = arith.constant 2 : index
    %c0_26 = arith.constant 0 : index
    %c0_27 = arith.constant 0 : index
    %27 = vector.load %arg6[%c2_25, %c0_26, %c0_27] : memref<3x8x32xbf16, #tpu.memory_space<vmem>>, vector<1x8x32xbf16>
    %28 = vector.shape_cast %27 : vector<1x8x32xbf16> to vector<8x32xbf16>
    %29 = arith.truncf %18 : vector<14x8xf32> to vector<14x8xbf16>
    %cst_28 = arith.constant dense<0.000000e+00> : vector<14x32xf32>
    %30 = tpu.matmul %29, %28, %cst_28 {dimension_numbers = #tpu.dot_dimension_numbers<[1], [0], [0], [1], [0, 0, 1, 1], [], []>} : vector<14x8xbf16>, vector<8x32xbf16>, vector<14x32xf32> -> vector<14x32xf32>
    %c0_29 = arith.constant 0 : index
    %c0_30 = arith.constant 0 : index
    %31 = vector.load %arg7[%c0_29, %c0_30] : memref<1x32xf32, #tpu.memory_space<vmem>>, vector<1x32xf32>
    %32 = vector.extract_strided_slice %22 {offsets = [0, 0], sizes = [2, 32], strides = [1, 1]} : vector<14x32xf32> to vector<2x32xf32>
    %33 = vector.broadcast %31 : vector<1x32xf32> to vector<2x32xf32>
    %34 = arith.addf %33, %32 : vector<2x32xf32>
    %35 = vector.extract_strided_slice %26 {offsets = [2, 0], sizes = [2, 32], strides = [1, 1]} : vector<14x32xf32> to vector<2x32xf32>
    %36 = arith.addf %34, %35 : vector<2x32xf32>
    %37 = vector.extract_strided_slice %30 {offsets = [4, 0], sizes = [2, 32], strides = [1, 1]} : vector<14x32xf32> to vector<2x32xf32>
    %38 = arith.addf %36, %37 : vector<2x32xf32>
    %cst_31 = arith.constant 0.000000e+00 : f32
    %39 = vector.broadcast %cst_31 : f32 to vector<2x32xf32>
    %40 = arith.maximumf %38, %39 : vector<2x32xf32>
    %c0_32 = arith.constant 0 : index
    %c0_33 = arith.constant 0 : index
    %41 = vector.load %arg7[%c0_32, %c0_33] : memref<1x32xf32, #tpu.memory_space<vmem>>, vector<1x32xf32>
    %42 = vector.extract_strided_slice %22 {offsets = [4, 0], sizes = [2, 32], strides = [1, 1]} : vector<14x32xf32> to vector<2x32xf32>
    %43 = vector.broadcast %41 : vector<1x32xf32> to vector<2x32xf32>
    %44 = arith.addf %43, %42 : vector<2x32xf32>
    %45 = vector.extract_strided_slice %26 {offsets = [6, 0], sizes = [2, 32], strides = [1, 1]} : vector<14x32xf32> to vector<2x32xf32>
    %46 = arith.addf %44, %45 : vector<2x32xf32>
    %47 = vector.extract_strided_slice %30 {offsets = [8, 0], sizes = [2, 32], strides = [1, 1]} : vector<14x32xf32> to vector<2x32xf32>
    %48 = arith.addf %46, %47 : vector<2x32xf32>
    %cst_34 = arith.constant 0.000000e+00 : f32
    %49 = vector.broadcast %cst_34 : f32 to vector<2x32xf32>
    %50 = arith.maximumf %48, %49 : vector<2x32xf32>
    %c0_35 = arith.constant 0 : index
    %c0_36 = arith.constant 0 : index
    %51 = vector.load %arg7[%c0_35, %c0_36] : memref<1x32xf32, #tpu.memory_space<vmem>>, vector<1x32xf32>
    %52 = vector.extract_strided_slice %22 {offsets = [8, 0], sizes = [2, 32], strides = [1, 1]} : vector<14x32xf32> to vector<2x32xf32>
    %53 = vector.broadcast %51 : vector<1x32xf32> to vector<2x32xf32>
    %54 = arith.addf %53, %52 : vector<2x32xf32>
    %55 = vector.extract_strided_slice %26 {offsets = [10, 0], sizes = [2, 32], strides = [1, 1]} : vector<14x32xf32> to vector<2x32xf32>
    %56 = arith.addf %54, %55 : vector<2x32xf32>
    %57 = vector.extract_strided_slice %30 {offsets = [12, 0], sizes = [2, 32], strides = [1, 1]} : vector<14x32xf32> to vector<2x32xf32>
    %58 = arith.addf %56, %57 : vector<2x32xf32>
    %cst_37 = arith.constant 0.000000e+00 : f32
    %59 = vector.broadcast %cst_37 : f32 to vector<2x32xf32>
    %60 = arith.maximumf %58, %59 : vector<2x32xf32>
    %61 = tpu.concatenate %40, %50, %60 in 0 : vector<2x32xf32>, vector<2x32xf32>, vector<2x32xf32> -> vector<6x32xf32>
    %c0_38 = arith.constant 0 : index
    %c0_39 = arith.constant 0 : index
    %62 = vector.load %arg8[%c0_38, %c0_39] : memref<32x96xbf16, #tpu.memory_space<vmem>>, vector<32x96xbf16>
    %63 = arith.truncf %61 : vector<6x32xf32> to vector<6x32xbf16>
    %cst_40 = arith.constant dense<0.000000e+00> : vector<6x96xf32>
    %64 = tpu.matmul %63, %62, %cst_40 {dimension_numbers = #tpu.dot_dimension_numbers<[1], [0], [0], [1], [0, 0, 1, 1], [], []>} : vector<6x32xbf16>, vector<32x96xbf16>, vector<6x96xf32> -> vector<6x96xf32>
    %c0_41 = arith.constant 0 : index
    %c0_42 = arith.constant 0 : index
    %65 = vector.load %arg9[%c0_41, %c0_42] : memref<1x96xf32, #tpu.memory_space<vmem>>, vector<1x96xf32>
    %66 = vector.broadcast %65 : vector<1x96xf32> to vector<6x96xf32>
    %67 = arith.addf %64, %66 : vector<6x96xf32>
    %cst_43 = arith.constant 0.000000e+00 : f32
    %68 = vector.broadcast %cst_43 : f32 to vector<2x32xf32>
    %c0_44 = arith.constant 0 : index
    %c0_45 = arith.constant 0 : index
    %69 = vector.load %arg10[%c0_44, %c0_45] : memref<32x96xbf16, #tpu.memory_space<vmem>>, vector<32x96xbf16>
    %70 = arith.truncf %68 : vector<2x32xf32> to vector<2x32xbf16>
    %cst_46 = arith.constant dense<0.000000e+00> : vector<2x96xf32>
    %71 = tpu.matmul %70, %69, %cst_46 {dimension_numbers = #tpu.dot_dimension_numbers<[1], [0], [0], [1], [0, 0, 1, 1], [], []>} : vector<2x32xbf16>, vector<32x96xbf16>, vector<2x96xf32> -> vector<2x96xf32>
    %c0_47 = arith.constant 0 : index
    %c0_48 = arith.constant 0 : index
    %72 = vector.load %arg11[%c0_47, %c0_48] : memref<1x96xf32, #tpu.memory_space<vmem>>, vector<1x96xf32>
    %73 = vector.broadcast %72 : vector<1x96xf32> to vector<2x96xf32>
    %74 = arith.addf %71, %73 : vector<2x96xf32>
    %75 = vector.extract_strided_slice %67 {offsets = [0, 0], sizes = [2, 48], strides = [1, 1]} : vector<6x96xf32> to vector<2x48xf32>
    %76 = vector.extract_strided_slice %67 {offsets = [4, 48], sizes = [2, 48], strides = [1, 1]} : vector<6x96xf32> to vector<2x48xf32>
    %77 = vector.extract_strided_slice %74 {offsets = [0, 0], sizes = [2, 48], strides = [1, 1]} : vector<2x96xf32> to vector<2x48xf32>
    %78 = vector.extract_strided_slice %68 {offsets = [0, 0], sizes = [2, 16], strides = [1, 1]} : vector<2x32xf32> to vector<2x16xf32>
    %79 = vector.extract_strided_slice %75 {offsets = [0, 0], sizes = [2, 16], strides = [1, 1]} : vector<2x48xf32> to vector<2x16xf32>
    %80 = vector.extract_strided_slice %77 {offsets = [0, 0], sizes = [2, 16], strides = [1, 1]} : vector<2x48xf32> to vector<2x16xf32>
    %81 = arith.addf %79, %80 : vector<2x16xf32>
    %82 = arith.negf %81 : vector<2x16xf32>
    %83 = math.exp %82 : vector<2x16xf32>
    %cst_49 = arith.constant 1.000000e+00 : f32
    %84 = vector.broadcast %cst_49 : f32 to vector<2x16xf32>
    %85 = arith.addf %84, %83 : vector<2x16xf32>
    %86 = arith.divf %84, %85 : vector<2x16xf32>
    %87 = vector.extract_strided_slice %75 {offsets = [0, 16], sizes = [2, 16], strides = [1, 1]} : vector<2x48xf32> to vector<2x16xf32>
    %88 = vector.extract_strided_slice %77 {offsets = [0, 16], sizes = [2, 16], strides = [1, 1]} : vector<2x48xf32> to vector<2x16xf32>
    %89 = arith.addf %87, %88 : vector<2x16xf32>
    %90 = arith.negf %89 : vector<2x16xf32>
    %91 = math.exp %90 : vector<2x16xf32>
    %cst_50 = arith.constant 1.000000e+00 : f32
    %92 = vector.broadcast %cst_50 : f32 to vector<2x16xf32>
    %93 = arith.addf %92, %91 : vector<2x16xf32>
    %94 = arith.divf %92, %93 : vector<2x16xf32>
    %95 = vector.extract_strided_slice %75 {offsets = [0, 32], sizes = [2, 16], strides = [1, 1]} : vector<2x48xf32> to vector<2x16xf32>
    %96 = vector.extract_strided_slice %77 {offsets = [0, 32], sizes = [2, 16], strides = [1, 1]} : vector<2x48xf32> to vector<2x16xf32>
    %97 = arith.mulf %86, %96 : vector<2x16xf32>
    %98 = arith.addf %95, %97 : vector<2x16xf32>
    %99 = math.tanh %98 : vector<2x16xf32>
    %cst_51 = arith.constant 1.000000e+00 : f32
    %100 = vector.broadcast %cst_51 : f32 to vector<2x16xf32>
    %101 = arith.subf %100, %94 : vector<2x16xf32>
    %102 = arith.mulf %101, %99 : vector<2x16xf32>
    %103 = arith.mulf %94, %78 : vector<2x16xf32>
    %104 = arith.addf %102, %103 : vector<2x16xf32>
    %105 = vector.extract_strided_slice %74 {offsets = [0, 48], sizes = [2, 48], strides = [1, 1]} : vector<2x96xf32> to vector<2x48xf32>
    %106 = vector.extract_strided_slice %68 {offsets = [0, 16], sizes = [2, 16], strides = [1, 1]} : vector<2x32xf32> to vector<2x16xf32>
    %107 = vector.extract_strided_slice %76 {offsets = [0, 0], sizes = [2, 16], strides = [1, 1]} : vector<2x48xf32> to vector<2x16xf32>
    %108 = vector.extract_strided_slice %105 {offsets = [0, 0], sizes = [2, 16], strides = [1, 1]} : vector<2x48xf32> to vector<2x16xf32>
    %109 = arith.addf %107, %108 : vector<2x16xf32>
    %110 = arith.negf %109 : vector<2x16xf32>
    %111 = math.exp %110 : vector<2x16xf32>
    %cst_52 = arith.constant 1.000000e+00 : f32
    %112 = vector.broadcast %cst_52 : f32 to vector<2x16xf32>
    %113 = arith.addf %112, %111 : vector<2x16xf32>
    %114 = arith.divf %112, %113 : vector<2x16xf32>
    %115 = vector.extract_strided_slice %76 {offsets = [0, 16], sizes = [2, 16], strides = [1, 1]} : vector<2x48xf32> to vector<2x16xf32>
    %116 = vector.extract_strided_slice %105 {offsets = [0, 16], sizes = [2, 16], strides = [1, 1]} : vector<2x48xf32> to vector<2x16xf32>
    %117 = arith.addf %115, %116 : vector<2x16xf32>
    %118 = arith.negf %117 : vector<2x16xf32>
    %119 = math.exp %118 : vector<2x16xf32>
    %cst_53 = arith.constant 1.000000e+00 : f32
    %120 = vector.broadcast %cst_53 : f32 to vector<2x16xf32>
    %121 = arith.addf %120, %119 : vector<2x16xf32>
    %122 = arith.divf %120, %121 : vector<2x16xf32>
    %123 = vector.extract_strided_slice %76 {offsets = [0, 32], sizes = [2, 16], strides = [1, 1]} : vector<2x48xf32> to vector<2x16xf32>
    %124 = vector.extract_strided_slice %105 {offsets = [0, 32], sizes = [2, 16], strides = [1, 1]} : vector<2x48xf32> to vector<2x16xf32>
    %125 = arith.mulf %114, %124 : vector<2x16xf32>
    %126 = arith.addf %123, %125 : vector<2x16xf32>
    %127 = math.tanh %126 : vector<2x16xf32>
    %cst_54 = arith.constant 1.000000e+00 : f32
    %128 = vector.broadcast %cst_54 : f32 to vector<2x16xf32>
    %129 = arith.subf %128, %122 : vector<2x16xf32>
    %130 = arith.mulf %129, %127 : vector<2x16xf32>
    %131 = arith.mulf %122, %106 : vector<2x16xf32>
    %132 = arith.addf %130, %131 : vector<2x16xf32>
    %133 = tpu.concatenate %104, %132 in 1 : vector<2x16xf32>, vector<2x16xf32> -> vector<2x32xf32>
    %c0_55 = arith.constant 0 : index
    %c0_56 = arith.constant 0 : index
    %134 = vector.load %arg10[%c0_55, %c0_56] : memref<32x96xbf16, #tpu.memory_space<vmem>>, vector<32x96xbf16>
    %135 = arith.truncf %133 : vector<2x32xf32> to vector<2x32xbf16>
    %cst_57 = arith.constant dense<0.000000e+00> : vector<2x96xf32>
    %136 = tpu.matmul %135, %134, %cst_57 {dimension_numbers = #tpu.dot_dimension_numbers<[1], [0], [0], [1], [0, 0, 1, 1], [], []>} : vector<2x32xbf16>, vector<32x96xbf16>, vector<2x96xf32> -> vector<2x96xf32>
    %c0_58 = arith.constant 0 : index
    %c0_59 = arith.constant 0 : index
    %137 = vector.load %arg11[%c0_58, %c0_59] : memref<1x96xf32, #tpu.memory_space<vmem>>, vector<1x96xf32>
    %138 = vector.broadcast %137 : vector<1x96xf32> to vector<2x96xf32>
    %139 = arith.addf %136, %138 : vector<2x96xf32>
    %140 = vector.extract_strided_slice %67 {offsets = [2, 0], sizes = [2, 48], strides = [1, 1]} : vector<6x96xf32> to vector<2x48xf32>
    %141 = vector.extract_strided_slice %67 {offsets = [2, 48], sizes = [2, 48], strides = [1, 1]} : vector<6x96xf32> to vector<2x48xf32>
    %142 = vector.extract_strided_slice %139 {offsets = [0, 0], sizes = [2, 48], strides = [1, 1]} : vector<2x96xf32> to vector<2x48xf32>
    %143 = vector.extract_strided_slice %133 {offsets = [0, 0], sizes = [2, 16], strides = [1, 1]} : vector<2x32xf32> to vector<2x16xf32>
    %144 = vector.extract_strided_slice %140 {offsets = [0, 0], sizes = [2, 16], strides = [1, 1]} : vector<2x48xf32> to vector<2x16xf32>
    %145 = vector.extract_strided_slice %142 {offsets = [0, 0], sizes = [2, 16], strides = [1, 1]} : vector<2x48xf32> to vector<2x16xf32>
    %146 = arith.addf %144, %145 : vector<2x16xf32>
    %147 = arith.negf %146 : vector<2x16xf32>
    %148 = math.exp %147 : vector<2x16xf32>
    %cst_60 = arith.constant 1.000000e+00 : f32
    %149 = vector.broadcast %cst_60 : f32 to vector<2x16xf32>
    %150 = arith.addf %149, %148 : vector<2x16xf32>
    %151 = arith.divf %149, %150 : vector<2x16xf32>
    %152 = vector.extract_strided_slice %140 {offsets = [0, 16], sizes = [2, 16], strides = [1, 1]} : vector<2x48xf32> to vector<2x16xf32>
    %153 = vector.extract_strided_slice %142 {offsets = [0, 16], sizes = [2, 16], strides = [1, 1]} : vector<2x48xf32> to vector<2x16xf32>
    %154 = arith.addf %152, %153 : vector<2x16xf32>
    %155 = arith.negf %154 : vector<2x16xf32>
    %156 = math.exp %155 : vector<2x16xf32>
    %cst_61 = arith.constant 1.000000e+00 : f32
    %157 = vector.broadcast %cst_61 : f32 to vector<2x16xf32>
    %158 = arith.addf %157, %156 : vector<2x16xf32>
    %159 = arith.divf %157, %158 : vector<2x16xf32>
    %160 = vector.extract_strided_slice %140 {offsets = [0, 32], sizes = [2, 16], strides = [1, 1]} : vector<2x48xf32> to vector<2x16xf32>
    %161 = vector.extract_strided_slice %142 {offsets = [0, 32], sizes = [2, 16], strides = [1, 1]} : vector<2x48xf32> to vector<2x16xf32>
    %162 = arith.mulf %151, %161 : vector<2x16xf32>
    %163 = arith.addf %160, %162 : vector<2x16xf32>
    %164 = math.tanh %163 : vector<2x16xf32>
    %cst_62 = arith.constant 1.000000e+00 : f32
    %165 = vector.broadcast %cst_62 : f32 to vector<2x16xf32>
    %166 = arith.subf %165, %159 : vector<2x16xf32>
    %167 = arith.mulf %166, %164 : vector<2x16xf32>
    %168 = arith.mulf %159, %143 : vector<2x16xf32>
    %169 = arith.addf %167, %168 : vector<2x16xf32>
    %170 = vector.extract_strided_slice %139 {offsets = [0, 48], sizes = [2, 48], strides = [1, 1]} : vector<2x96xf32> to vector<2x48xf32>
    %171 = vector.extract_strided_slice %133 {offsets = [0, 16], sizes = [2, 16], strides = [1, 1]} : vector<2x32xf32> to vector<2x16xf32>
    %172 = vector.extract_strided_slice %141 {offsets = [0, 0], sizes = [2, 16], strides = [1, 1]} : vector<2x48xf32> to vector<2x16xf32>
    %173 = vector.extract_strided_slice %170 {offsets = [0, 0], sizes = [2, 16], strides = [1, 1]} : vector<2x48xf32> to vector<2x16xf32>
    %174 = arith.addf %172, %173 : vector<2x16xf32>
    %175 = arith.negf %174 : vector<2x16xf32>
    %176 = math.exp %175 : vector<2x16xf32>
    %cst_63 = arith.constant 1.000000e+00 : f32
    %177 = vector.broadcast %cst_63 : f32 to vector<2x16xf32>
    %178 = arith.addf %177, %176 : vector<2x16xf32>
    %179 = arith.divf %177, %178 : vector<2x16xf32>
    %180 = vector.extract_strided_slice %141 {offsets = [0, 16], sizes = [2, 16], strides = [1, 1]} : vector<2x48xf32> to vector<2x16xf32>
    %181 = vector.extract_strided_slice %170 {offsets = [0, 16], sizes = [2, 16], strides = [1, 1]} : vector<2x48xf32> to vector<2x16xf32>
    %182 = arith.addf %180, %181 : vector<2x16xf32>
    %183 = arith.negf %182 : vector<2x16xf32>
    %184 = math.exp %183 : vector<2x16xf32>
    %cst_64 = arith.constant 1.000000e+00 : f32
    %185 = vector.broadcast %cst_64 : f32 to vector<2x16xf32>
    %186 = arith.addf %185, %184 : vector<2x16xf32>
    %187 = arith.divf %185, %186 : vector<2x16xf32>
    %188 = vector.extract_strided_slice %141 {offsets = [0, 32], sizes = [2, 16], strides = [1, 1]} : vector<2x48xf32> to vector<2x16xf32>
    %189 = vector.extract_strided_slice %170 {offsets = [0, 32], sizes = [2, 16], strides = [1, 1]} : vector<2x48xf32> to vector<2x16xf32>
    %190 = arith.mulf %179, %189 : vector<2x16xf32>
    %191 = arith.addf %188, %190 : vector<2x16xf32>
    %192 = math.tanh %191 : vector<2x16xf32>
    %cst_65 = arith.constant 1.000000e+00 : f32
    %193 = vector.broadcast %cst_65 : f32 to vector<2x16xf32>
    %194 = arith.subf %193, %187 : vector<2x16xf32>
    %195 = arith.mulf %194, %192 : vector<2x16xf32>
    %196 = arith.mulf %187, %171 : vector<2x16xf32>
    %197 = arith.addf %195, %196 : vector<2x16xf32>
    %198 = tpu.concatenate %169, %197 in 1 : vector<2x16xf32>, vector<2x16xf32> -> vector<2x32xf32>
    %c0_66 = arith.constant 0 : index
    %c0_67 = arith.constant 0 : index
    %199 = vector.load %arg10[%c0_66, %c0_67] : memref<32x96xbf16, #tpu.memory_space<vmem>>, vector<32x96xbf16>
    %200 = arith.truncf %198 : vector<2x32xf32> to vector<2x32xbf16>
    %cst_68 = arith.constant dense<0.000000e+00> : vector<2x96xf32>
    %201 = tpu.matmul %200, %199, %cst_68 {dimension_numbers = #tpu.dot_dimension_numbers<[1], [0], [0], [1], [0, 0, 1, 1], [], []>} : vector<2x32xbf16>, vector<32x96xbf16>, vector<2x96xf32> -> vector<2x96xf32>
    %c0_69 = arith.constant 0 : index
    %c0_70 = arith.constant 0 : index
    %202 = vector.load %arg11[%c0_69, %c0_70] : memref<1x96xf32, #tpu.memory_space<vmem>>, vector<1x96xf32>
    %203 = vector.broadcast %202 : vector<1x96xf32> to vector<2x96xf32>
    %204 = arith.addf %201, %203 : vector<2x96xf32>
    %205 = vector.extract_strided_slice %67 {offsets = [4, 0], sizes = [2, 48], strides = [1, 1]} : vector<6x96xf32> to vector<2x48xf32>
    %206 = vector.extract_strided_slice %67 {offsets = [0, 48], sizes = [2, 48], strides = [1, 1]} : vector<6x96xf32> to vector<2x48xf32>
    %207 = vector.extract_strided_slice %204 {offsets = [0, 0], sizes = [2, 48], strides = [1, 1]} : vector<2x96xf32> to vector<2x48xf32>
    %208 = vector.extract_strided_slice %198 {offsets = [0, 0], sizes = [2, 16], strides = [1, 1]} : vector<2x32xf32> to vector<2x16xf32>
    %209 = vector.extract_strided_slice %205 {offsets = [0, 0], sizes = [2, 16], strides = [1, 1]} : vector<2x48xf32> to vector<2x16xf32>
    %210 = vector.extract_strided_slice %207 {offsets = [0, 0], sizes = [2, 16], strides = [1, 1]} : vector<2x48xf32> to vector<2x16xf32>
    %211 = arith.addf %209, %210 : vector<2x16xf32>
    %212 = arith.negf %211 : vector<2x16xf32>
    %213 = math.exp %212 : vector<2x16xf32>
    %cst_71 = arith.constant 1.000000e+00 : f32
    %214 = vector.broadcast %cst_71 : f32 to vector<2x16xf32>
    %215 = arith.addf %214, %213 : vector<2x16xf32>
    %216 = arith.divf %214, %215 : vector<2x16xf32>
    %217 = vector.extract_strided_slice %205 {offsets = [0, 16], sizes = [2, 16], strides = [1, 1]} : vector<2x48xf32> to vector<2x16xf32>
    %218 = vector.extract_strided_slice %207 {offsets = [0, 16], sizes = [2, 16], strides = [1, 1]} : vector<2x48xf32> to vector<2x16xf32>
    %219 = arith.addf %217, %218 : vector<2x16xf32>
    %220 = arith.negf %219 : vector<2x16xf32>
    %221 = math.exp %220 : vector<2x16xf32>
    %cst_72 = arith.constant 1.000000e+00 : f32
    %222 = vector.broadcast %cst_72 : f32 to vector<2x16xf32>
    %223 = arith.addf %222, %221 : vector<2x16xf32>
    %224 = arith.divf %222, %223 : vector<2x16xf32>
    %225 = vector.extract_strided_slice %205 {offsets = [0, 32], sizes = [2, 16], strides = [1, 1]} : vector<2x48xf32> to vector<2x16xf32>
    %226 = vector.extract_strided_slice %207 {offsets = [0, 32], sizes = [2, 16], strides = [1, 1]} : vector<2x48xf32> to vector<2x16xf32>
    %227 = arith.mulf %216, %226 : vector<2x16xf32>
    %228 = arith.addf %225, %227 : vector<2x16xf32>
    %229 = math.tanh %228 : vector<2x16xf32>
    %cst_73 = arith.constant 1.000000e+00 : f32
    %230 = vector.broadcast %cst_73 : f32 to vector<2x16xf32>
    %231 = arith.subf %230, %224 : vector<2x16xf32>
    %232 = arith.mulf %231, %229 : vector<2x16xf32>
    %233 = arith.mulf %224, %208 : vector<2x16xf32>
    %234 = arith.addf %232, %233 : vector<2x16xf32>
    %235 = vector.extract_strided_slice %204 {offsets = [0, 48], sizes = [2, 48], strides = [1, 1]} : vector<2x96xf32> to vector<2x48xf32>
    %236 = vector.extract_strided_slice %198 {offsets = [0, 16], sizes = [2, 16], strides = [1, 1]} : vector<2x32xf32> to vector<2x16xf32>
    %237 = vector.extract_strided_slice %206 {offsets = [0, 0], sizes = [2, 16], strides = [1, 1]} : vector<2x48xf32> to vector<2x16xf32>
    %238 = vector.extract_strided_slice %235 {offsets = [0, 0], sizes = [2, 16], strides = [1, 1]} : vector<2x48xf32> to vector<2x16xf32>
    %239 = arith.addf %237, %238 : vector<2x16xf32>
    %240 = arith.negf %239 : vector<2x16xf32>
    %241 = math.exp %240 : vector<2x16xf32>
    %cst_74 = arith.constant 1.000000e+00 : f32
    %242 = vector.broadcast %cst_74 : f32 to vector<2x16xf32>
    %243 = arith.addf %242, %241 : vector<2x16xf32>
    %244 = arith.divf %242, %243 : vector<2x16xf32>
    %245 = vector.extract_strided_slice %206 {offsets = [0, 16], sizes = [2, 16], strides = [1, 1]} : vector<2x48xf32> to vector<2x16xf32>
    %246 = vector.extract_strided_slice %235 {offsets = [0, 16], sizes = [2, 16], strides = [1, 1]} : vector<2x48xf32> to vector<2x16xf32>
    %247 = arith.addf %245, %246 : vector<2x16xf32>
    %248 = arith.negf %247 : vector<2x16xf32>
    %249 = math.exp %248 : vector<2x16xf32>
    %cst_75 = arith.constant 1.000000e+00 : f32
    %250 = vector.broadcast %cst_75 : f32 to vector<2x16xf32>
    %251 = arith.addf %250, %249 : vector<2x16xf32>
    %252 = arith.divf %250, %251 : vector<2x16xf32>
    %253 = vector.extract_strided_slice %206 {offsets = [0, 32], sizes = [2, 16], strides = [1, 1]} : vector<2x48xf32> to vector<2x16xf32>
    %254 = vector.extract_strided_slice %235 {offsets = [0, 32], sizes = [2, 16], strides = [1, 1]} : vector<2x48xf32> to vector<2x16xf32>
    %255 = arith.mulf %244, %254 : vector<2x16xf32>
    %256 = arith.addf %253, %255 : vector<2x16xf32>
    %257 = math.tanh %256 : vector<2x16xf32>
    %cst_76 = arith.constant 1.000000e+00 : f32
    %258 = vector.broadcast %cst_76 : f32 to vector<2x16xf32>
    %259 = arith.subf %258, %252 : vector<2x16xf32>
    %260 = arith.mulf %259, %257 : vector<2x16xf32>
    %261 = arith.mulf %252, %236 : vector<2x16xf32>
    %262 = arith.addf %260, %261 : vector<2x16xf32>
    %263 = tpu.concatenate %104, %169, %234 in 0 : vector<2x16xf32>, vector<2x16xf32>, vector<2x16xf32> -> vector<6x16xf32>
    %264 = tpu.concatenate %262, %197, %132 in 0 : vector<2x16xf32>, vector<2x16xf32>, vector<2x16xf32> -> vector<6x16xf32>
    %265 = tpu.concatenate %263, %264 in 1 : vector<6x16xf32>, vector<6x16xf32> -> vector<6x32xf32>
    %c0_77 = arith.constant 0 : index
    %c0_78 = arith.constant 0 : index
    %266 = vector.load %arg12[%c0_77, %c0_78] : memref<32x96xbf16, #tpu.memory_space<vmem>>, vector<32x96xbf16>
    %267 = arith.truncf %265 : vector<6x32xf32> to vector<6x32xbf16>
    %cst_79 = arith.constant dense<0.000000e+00> : vector<6x96xf32>
    %268 = tpu.matmul %267, %266, %cst_79 {dimension_numbers = #tpu.dot_dimension_numbers<[1], [0], [0], [1], [0, 0, 1, 1], [], []>} : vector<6x32xbf16>, vector<32x96xbf16>, vector<6x96xf32> -> vector<6x96xf32>
    %c0_80 = arith.constant 0 : index
    %c0_81 = arith.constant 0 : index
    %269 = vector.load %arg13[%c0_80, %c0_81] : memref<1x96xf32, #tpu.memory_space<vmem>>, vector<1x96xf32>
    %270 = vector.broadcast %269 : vector<1x96xf32> to vector<6x96xf32>
    %271 = arith.addf %268, %270 : vector<6x96xf32>
    %cst_82 = arith.constant 0.000000e+00 : f32
    %272 = vector.broadcast %cst_82 : f32 to vector<2x32xf32>
    %c0_83 = arith.constant 0 : index
    %c0_84 = arith.constant 0 : index
    %273 = vector.load %arg14[%c0_83, %c0_84] : memref<32x96xbf16, #tpu.memory_space<vmem>>, vector<32x96xbf16>
    %274 = arith.truncf %272 : vector<2x32xf32> to vector<2x32xbf16>
    %cst_85 = arith.constant dense<0.000000e+00> : vector<2x96xf32>
    %275 = tpu.matmul %274, %273, %cst_85 {dimension_numbers = #tpu.dot_dimension_numbers<[1], [0], [0], [1], [0, 0, 1, 1], [], []>} : vector<2x32xbf16>, vector<32x96xbf16>, vector<2x96xf32> -> vector<2x96xf32>
    %c0_86 = arith.constant 0 : index
    %c0_87 = arith.constant 0 : index
    %276 = vector.load %arg15[%c0_86, %c0_87] : memref<1x96xf32, #tpu.memory_space<vmem>>, vector<1x96xf32>
    %277 = vector.broadcast %276 : vector<1x96xf32> to vector<2x96xf32>
    %278 = arith.addf %275, %277 : vector<2x96xf32>
    %279 = vector.extract_strided_slice %271 {offsets = [0, 0], sizes = [2, 48], strides = [1, 1]} : vector<6x96xf32> to vector<2x48xf32>
    %280 = vector.extract_strided_slice %271 {offsets = [4, 48], sizes = [2, 48], strides = [1, 1]} : vector<6x96xf32> to vector<2x48xf32>
    %281 = vector.extract_strided_slice %278 {offsets = [0, 0], sizes = [2, 48], strides = [1, 1]} : vector<2x96xf32> to vector<2x48xf32>
    %282 = vector.extract_strided_slice %272 {offsets = [0, 0], sizes = [2, 16], strides = [1, 1]} : vector<2x32xf32> to vector<2x16xf32>
    %283 = vector.extract_strided_slice %279 {offsets = [0, 0], sizes = [2, 16], strides = [1, 1]} : vector<2x48xf32> to vector<2x16xf32>
    %284 = vector.extract_strided_slice %281 {offsets = [0, 0], sizes = [2, 16], strides = [1, 1]} : vector<2x48xf32> to vector<2x16xf32>
    %285 = arith.addf %283, %284 : vector<2x16xf32>
    %286 = arith.negf %285 : vector<2x16xf32>
    %287 = math.exp %286 : vector<2x16xf32>
    %cst_88 = arith.constant 1.000000e+00 : f32
    %288 = vector.broadcast %cst_88 : f32 to vector<2x16xf32>
    %289 = arith.addf %288, %287 : vector<2x16xf32>
    %290 = arith.divf %288, %289 : vector<2x16xf32>
    %291 = vector.extract_strided_slice %279 {offsets = [0, 16], sizes = [2, 16], strides = [1, 1]} : vector<2x48xf32> to vector<2x16xf32>
    %292 = vector.extract_strided_slice %281 {offsets = [0, 16], sizes = [2, 16], strides = [1, 1]} : vector<2x48xf32> to vector<2x16xf32>
    %293 = arith.addf %291, %292 : vector<2x16xf32>
    %294 = arith.negf %293 : vector<2x16xf32>
    %295 = math.exp %294 : vector<2x16xf32>
    %cst_89 = arith.constant 1.000000e+00 : f32
    %296 = vector.broadcast %cst_89 : f32 to vector<2x16xf32>
    %297 = arith.addf %296, %295 : vector<2x16xf32>
    %298 = arith.divf %296, %297 : vector<2x16xf32>
    %299 = vector.extract_strided_slice %279 {offsets = [0, 32], sizes = [2, 16], strides = [1, 1]} : vector<2x48xf32> to vector<2x16xf32>
    %300 = vector.extract_strided_slice %281 {offsets = [0, 32], sizes = [2, 16], strides = [1, 1]} : vector<2x48xf32> to vector<2x16xf32>
    %301 = arith.mulf %290, %300 : vector<2x16xf32>
    %302 = arith.addf %299, %301 : vector<2x16xf32>
    %303 = math.tanh %302 : vector<2x16xf32>
    %cst_90 = arith.constant 1.000000e+00 : f32
    %304 = vector.broadcast %cst_90 : f32 to vector<2x16xf32>
    %305 = arith.subf %304, %298 : vector<2x16xf32>
    %306 = arith.mulf %305, %303 : vector<2x16xf32>
    %307 = arith.mulf %298, %282 : vector<2x16xf32>
    %308 = arith.addf %306, %307 : vector<2x16xf32>
    %309 = vector.extract_strided_slice %278 {offsets = [0, 48], sizes = [2, 48], strides = [1, 1]} : vector<2x96xf32> to vector<2x48xf32>
    %310 = vector.extract_strided_slice %272 {offsets = [0, 16], sizes = [2, 16], strides = [1, 1]} : vector<2x32xf32> to vector<2x16xf32>
    %311 = vector.extract_strided_slice %280 {offsets = [0, 0], sizes = [2, 16], strides = [1, 1]} : vector<2x48xf32> to vector<2x16xf32>
    %312 = vector.extract_strided_slice %309 {offsets = [0, 0], sizes = [2, 16], strides = [1, 1]} : vector<2x48xf32> to vector<2x16xf32>
    %313 = arith.addf %311, %312 : vector<2x16xf32>
    %314 = arith.negf %313 : vector<2x16xf32>
    %315 = math.exp %314 : vector<2x16xf32>
    %cst_91 = arith.constant 1.000000e+00 : f32
    %316 = vector.broadcast %cst_91 : f32 to vector<2x16xf32>
    %317 = arith.addf %316, %315 : vector<2x16xf32>
    %318 = arith.divf %316, %317 : vector<2x16xf32>
    %319 = vector.extract_strided_slice %280 {offsets = [0, 16], sizes = [2, 16], strides = [1, 1]} : vector<2x48xf32> to vector<2x16xf32>
    %320 = vector.extract_strided_slice %309 {offsets = [0, 16], sizes = [2, 16], strides = [1, 1]} : vector<2x48xf32> to vector<2x16xf32>
    %321 = arith.addf %319, %320 : vector<2x16xf32>
    %322 = arith.negf %321 : vector<2x16xf32>
    %323 = math.exp %322 : vector<2x16xf32>
    %cst_92 = arith.constant 1.000000e+00 : f32
    %324 = vector.broadcast %cst_92 : f32 to vector<2x16xf32>
    %325 = arith.addf %324, %323 : vector<2x16xf32>
    %326 = arith.divf %324, %325 : vector<2x16xf32>
    %327 = vector.extract_strided_slice %280 {offsets = [0, 32], sizes = [2, 16], strides = [1, 1]} : vector<2x48xf32> to vector<2x16xf32>
    %328 = vector.extract_strided_slice %309 {offsets = [0, 32], sizes = [2, 16], strides = [1, 1]} : vector<2x48xf32> to vector<2x16xf32>
    %329 = arith.mulf %318, %328 : vector<2x16xf32>
    %330 = arith.addf %327, %329 : vector<2x16xf32>
    %331 = math.tanh %330 : vector<2x16xf32>
    %cst_93 = arith.constant 1.000000e+00 : f32
    %332 = vector.broadcast %cst_93 : f32 to vector<2x16xf32>
    %333 = arith.subf %332, %326 : vector<2x16xf32>
    %334 = arith.mulf %333, %331 : vector<2x16xf32>
    %335 = arith.mulf %326, %310 : vector<2x16xf32>
    %336 = arith.addf %334, %335 : vector<2x16xf32>
    %337 = tpu.concatenate %308, %336 in 1 : vector<2x16xf32>, vector<2x16xf32> -> vector<2x32xf32>
    %c0_94 = arith.constant 0 : index
    %c0_95 = arith.constant 0 : index
    %338 = vector.load %arg14[%c0_94, %c0_95] : memref<32x96xbf16, #tpu.memory_space<vmem>>, vector<32x96xbf16>
    %339 = arith.truncf %337 : vector<2x32xf32> to vector<2x32xbf16>
    %cst_96 = arith.constant dense<0.000000e+00> : vector<2x96xf32>
    %340 = tpu.matmul %339, %338, %cst_96 {dimension_numbers = #tpu.dot_dimension_numbers<[1], [0], [0], [1], [0, 0, 1, 1], [], []>} : vector<2x32xbf16>, vector<32x96xbf16>, vector<2x96xf32> -> vector<2x96xf32>
    %c0_97 = arith.constant 0 : index
    %c0_98 = arith.constant 0 : index
    %341 = vector.load %arg15[%c0_97, %c0_98] : memref<1x96xf32, #tpu.memory_space<vmem>>, vector<1x96xf32>
    %342 = vector.broadcast %341 : vector<1x96xf32> to vector<2x96xf32>
    %343 = arith.addf %340, %342 : vector<2x96xf32>
    %344 = vector.extract_strided_slice %271 {offsets = [2, 0], sizes = [2, 48], strides = [1, 1]} : vector<6x96xf32> to vector<2x48xf32>
    %345 = vector.extract_strided_slice %271 {offsets = [2, 48], sizes = [2, 48], strides = [1, 1]} : vector<6x96xf32> to vector<2x48xf32>
    %346 = vector.extract_strided_slice %343 {offsets = [0, 0], sizes = [2, 48], strides = [1, 1]} : vector<2x96xf32> to vector<2x48xf32>
    %347 = vector.extract_strided_slice %337 {offsets = [0, 0], sizes = [2, 16], strides = [1, 1]} : vector<2x32xf32> to vector<2x16xf32>
    %348 = vector.extract_strided_slice %344 {offsets = [0, 0], sizes = [2, 16], strides = [1, 1]} : vector<2x48xf32> to vector<2x16xf32>
    %349 = vector.extract_strided_slice %346 {offsets = [0, 0], sizes = [2, 16], strides = [1, 1]} : vector<2x48xf32> to vector<2x16xf32>
    %350 = arith.addf %348, %349 : vector<2x16xf32>
    %351 = arith.negf %350 : vector<2x16xf32>
    %352 = math.exp %351 : vector<2x16xf32>
    %cst_99 = arith.constant 1.000000e+00 : f32
    %353 = vector.broadcast %cst_99 : f32 to vector<2x16xf32>
    %354 = arith.addf %353, %352 : vector<2x16xf32>
    %355 = arith.divf %353, %354 : vector<2x16xf32>
    %356 = vector.extract_strided_slice %344 {offsets = [0, 16], sizes = [2, 16], strides = [1, 1]} : vector<2x48xf32> to vector<2x16xf32>
    %357 = vector.extract_strided_slice %346 {offsets = [0, 16], sizes = [2, 16], strides = [1, 1]} : vector<2x48xf32> to vector<2x16xf32>
    %358 = arith.addf %356, %357 : vector<2x16xf32>
    %359 = arith.negf %358 : vector<2x16xf32>
    %360 = math.exp %359 : vector<2x16xf32>
    %cst_100 = arith.constant 1.000000e+00 : f32
    %361 = vector.broadcast %cst_100 : f32 to vector<2x16xf32>
    %362 = arith.addf %361, %360 : vector<2x16xf32>
    %363 = arith.divf %361, %362 : vector<2x16xf32>
    %364 = vector.extract_strided_slice %344 {offsets = [0, 32], sizes = [2, 16], strides = [1, 1]} : vector<2x48xf32> to vector<2x16xf32>
    %365 = vector.extract_strided_slice %346 {offsets = [0, 32], sizes = [2, 16], strides = [1, 1]} : vector<2x48xf32> to vector<2x16xf32>
    %366 = arith.mulf %355, %365 : vector<2x16xf32>
    %367 = arith.addf %364, %366 : vector<2x16xf32>
    %368 = math.tanh %367 : vector<2x16xf32>
    %cst_101 = arith.constant 1.000000e+00 : f32
    %369 = vector.broadcast %cst_101 : f32 to vector<2x16xf32>
    %370 = arith.subf %369, %363 : vector<2x16xf32>
    %371 = arith.mulf %370, %368 : vector<2x16xf32>
    %372 = arith.mulf %363, %347 : vector<2x16xf32>
    %373 = arith.addf %371, %372 : vector<2x16xf32>
    %374 = vector.extract_strided_slice %343 {offsets = [0, 48], sizes = [2, 48], strides = [1, 1]} : vector<2x96xf32> to vector<2x48xf32>
    %375 = vector.extract_strided_slice %337 {offsets = [0, 16], sizes = [2, 16], strides = [1, 1]} : vector<2x32xf32> to vector<2x16xf32>
    %376 = vector.extract_strided_slice %345 {offsets = [0, 0], sizes = [2, 16], strides = [1, 1]} : vector<2x48xf32> to vector<2x16xf32>
    %377 = vector.extract_strided_slice %374 {offsets = [0, 0], sizes = [2, 16], strides = [1, 1]} : vector<2x48xf32> to vector<2x16xf32>
    %378 = arith.addf %376, %377 : vector<2x16xf32>
    %379 = arith.negf %378 : vector<2x16xf32>
    %380 = math.exp %379 : vector<2x16xf32>
    %cst_102 = arith.constant 1.000000e+00 : f32
    %381 = vector.broadcast %cst_102 : f32 to vector<2x16xf32>
    %382 = arith.addf %381, %380 : vector<2x16xf32>
    %383 = arith.divf %381, %382 : vector<2x16xf32>
    %384 = vector.extract_strided_slice %345 {offsets = [0, 16], sizes = [2, 16], strides = [1, 1]} : vector<2x48xf32> to vector<2x16xf32>
    %385 = vector.extract_strided_slice %374 {offsets = [0, 16], sizes = [2, 16], strides = [1, 1]} : vector<2x48xf32> to vector<2x16xf32>
    %386 = arith.addf %384, %385 : vector<2x16xf32>
    %387 = arith.negf %386 : vector<2x16xf32>
    %388 = math.exp %387 : vector<2x16xf32>
    %cst_103 = arith.constant 1.000000e+00 : f32
    %389 = vector.broadcast %cst_103 : f32 to vector<2x16xf32>
    %390 = arith.addf %389, %388 : vector<2x16xf32>
    %391 = arith.divf %389, %390 : vector<2x16xf32>
    %392 = vector.extract_strided_slice %345 {offsets = [0, 32], sizes = [2, 16], strides = [1, 1]} : vector<2x48xf32> to vector<2x16xf32>
    %393 = vector.extract_strided_slice %374 {offsets = [0, 32], sizes = [2, 16], strides = [1, 1]} : vector<2x48xf32> to vector<2x16xf32>
    %394 = arith.mulf %383, %393 : vector<2x16xf32>
    %395 = arith.addf %392, %394 : vector<2x16xf32>
    %396 = math.tanh %395 : vector<2x16xf32>
    %cst_104 = arith.constant 1.000000e+00 : f32
    %397 = vector.broadcast %cst_104 : f32 to vector<2x16xf32>
    %398 = arith.subf %397, %391 : vector<2x16xf32>
    %399 = arith.mulf %398, %396 : vector<2x16xf32>
    %400 = arith.mulf %391, %375 : vector<2x16xf32>
    %401 = arith.addf %399, %400 : vector<2x16xf32>
    %402 = tpu.concatenate %373, %401 in 1 : vector<2x16xf32>, vector<2x16xf32> -> vector<2x32xf32>
    %c0_105 = arith.constant 0 : index
    %c0_106 = arith.constant 0 : index
    %403 = vector.load %arg14[%c0_105, %c0_106] : memref<32x96xbf16, #tpu.memory_space<vmem>>, vector<32x96xbf16>
    %404 = arith.truncf %402 : vector<2x32xf32> to vector<2x32xbf16>
    %cst_107 = arith.constant dense<0.000000e+00> : vector<2x96xf32>
    %405 = tpu.matmul %404, %403, %cst_107 {dimension_numbers = #tpu.dot_dimension_numbers<[1], [0], [0], [1], [0, 0, 1, 1], [], []>} : vector<2x32xbf16>, vector<32x96xbf16>, vector<2x96xf32> -> vector<2x96xf32>
    %c0_108 = arith.constant 0 : index
    %c0_109 = arith.constant 0 : index
    %406 = vector.load %arg15[%c0_108, %c0_109] : memref<1x96xf32, #tpu.memory_space<vmem>>, vector<1x96xf32>
    %407 = vector.broadcast %406 : vector<1x96xf32> to vector<2x96xf32>
    %408 = arith.addf %405, %407 : vector<2x96xf32>
    %409 = vector.extract_strided_slice %271 {offsets = [4, 0], sizes = [2, 48], strides = [1, 1]} : vector<6x96xf32> to vector<2x48xf32>
    %410 = vector.extract_strided_slice %271 {offsets = [0, 48], sizes = [2, 48], strides = [1, 1]} : vector<6x96xf32> to vector<2x48xf32>
    %411 = vector.extract_strided_slice %408 {offsets = [0, 0], sizes = [2, 48], strides = [1, 1]} : vector<2x96xf32> to vector<2x48xf32>
    %412 = vector.extract_strided_slice %402 {offsets = [0, 0], sizes = [2, 16], strides = [1, 1]} : vector<2x32xf32> to vector<2x16xf32>
    %413 = vector.extract_strided_slice %409 {offsets = [0, 0], sizes = [2, 16], strides = [1, 1]} : vector<2x48xf32> to vector<2x16xf32>
    %414 = vector.extract_strided_slice %411 {offsets = [0, 0], sizes = [2, 16], strides = [1, 1]} : vector<2x48xf32> to vector<2x16xf32>
    %415 = arith.addf %413, %414 : vector<2x16xf32>
    %416 = arith.negf %415 : vector<2x16xf32>
    %417 = math.exp %416 : vector<2x16xf32>
    %cst_110 = arith.constant 1.000000e+00 : f32
    %418 = vector.broadcast %cst_110 : f32 to vector<2x16xf32>
    %419 = arith.addf %418, %417 : vector<2x16xf32>
    %420 = arith.divf %418, %419 : vector<2x16xf32>
    %421 = vector.extract_strided_slice %409 {offsets = [0, 16], sizes = [2, 16], strides = [1, 1]} : vector<2x48xf32> to vector<2x16xf32>
    %422 = vector.extract_strided_slice %411 {offsets = [0, 16], sizes = [2, 16], strides = [1, 1]} : vector<2x48xf32> to vector<2x16xf32>
    %423 = arith.addf %421, %422 : vector<2x16xf32>
    %424 = arith.negf %423 : vector<2x16xf32>
    %425 = math.exp %424 : vector<2x16xf32>
    %cst_111 = arith.constant 1.000000e+00 : f32
    %426 = vector.broadcast %cst_111 : f32 to vector<2x16xf32>
    %427 = arith.addf %426, %425 : vector<2x16xf32>
    %428 = arith.divf %426, %427 : vector<2x16xf32>
    %429 = vector.extract_strided_slice %409 {offsets = [0, 32], sizes = [2, 16], strides = [1, 1]} : vector<2x48xf32> to vector<2x16xf32>
    %430 = vector.extract_strided_slice %411 {offsets = [0, 32], sizes = [2, 16], strides = [1, 1]} : vector<2x48xf32> to vector<2x16xf32>
    %431 = arith.mulf %420, %430 : vector<2x16xf32>
    %432 = arith.addf %429, %431 : vector<2x16xf32>
    %433 = math.tanh %432 : vector<2x16xf32>
    %cst_112 = arith.constant 1.000000e+00 : f32
    %434 = vector.broadcast %cst_112 : f32 to vector<2x16xf32>
    %435 = arith.subf %434, %428 : vector<2x16xf32>
    %436 = arith.mulf %435, %433 : vector<2x16xf32>
    %437 = arith.mulf %428, %412 : vector<2x16xf32>
    %438 = arith.addf %436, %437 : vector<2x16xf32>
    %439 = vector.extract_strided_slice %408 {offsets = [0, 48], sizes = [2, 48], strides = [1, 1]} : vector<2x96xf32> to vector<2x48xf32>
    %440 = vector.extract_strided_slice %402 {offsets = [0, 16], sizes = [2, 16], strides = [1, 1]} : vector<2x32xf32> to vector<2x16xf32>
    %441 = vector.extract_strided_slice %410 {offsets = [0, 0], sizes = [2, 16], strides = [1, 1]} : vector<2x48xf32> to vector<2x16xf32>
    %442 = vector.extract_strided_slice %439 {offsets = [0, 0], sizes = [2, 16], strides = [1, 1]} : vector<2x48xf32> to vector<2x16xf32>
    %443 = arith.addf %441, %442 : vector<2x16xf32>
    %444 = arith.negf %443 : vector<2x16xf32>
    %445 = math.exp %444 : vector<2x16xf32>
    %cst_113 = arith.constant 1.000000e+00 : f32
    %446 = vector.broadcast %cst_113 : f32 to vector<2x16xf32>
    %447 = arith.addf %446, %445 : vector<2x16xf32>
    %448 = arith.divf %446, %447 : vector<2x16xf32>
    %449 = vector.extract_strided_slice %410 {offsets = [0, 16], sizes = [2, 16], strides = [1, 1]} : vector<2x48xf32> to vector<2x16xf32>
    %450 = vector.extract_strided_slice %439 {offsets = [0, 16], sizes = [2, 16], strides = [1, 1]} : vector<2x48xf32> to vector<2x16xf32>
    %451 = arith.addf %449, %450 : vector<2x16xf32>
    %452 = arith.negf %451 : vector<2x16xf32>
    %453 = math.exp %452 : vector<2x16xf32>
    %cst_114 = arith.constant 1.000000e+00 : f32
    %454 = vector.broadcast %cst_114 : f32 to vector<2x16xf32>
    %455 = arith.addf %454, %453 : vector<2x16xf32>
    %456 = arith.divf %454, %455 : vector<2x16xf32>
    %457 = vector.extract_strided_slice %410 {offsets = [0, 32], sizes = [2, 16], strides = [1, 1]} : vector<2x48xf32> to vector<2x16xf32>
    %458 = vector.extract_strided_slice %439 {offsets = [0, 32], sizes = [2, 16], strides = [1, 1]} : vector<2x48xf32> to vector<2x16xf32>
    %459 = arith.mulf %448, %458 : vector<2x16xf32>
    %460 = arith.addf %457, %459 : vector<2x16xf32>
    %461 = math.tanh %460 : vector<2x16xf32>
    %cst_115 = arith.constant 1.000000e+00 : f32
    %462 = vector.broadcast %cst_115 : f32 to vector<2x16xf32>
    %463 = arith.subf %462, %456 : vector<2x16xf32>
    %464 = arith.mulf %463, %461 : vector<2x16xf32>
    %465 = arith.mulf %456, %440 : vector<2x16xf32>
    %466 = arith.addf %464, %465 : vector<2x16xf32>
    %467 = tpu.concatenate %308, %373, %438 in 0 : vector<2x16xf32>, vector<2x16xf32>, vector<2x16xf32> -> vector<6x16xf32>
    %468 = tpu.concatenate %466, %401, %336 in 0 : vector<2x16xf32>, vector<2x16xf32>, vector<2x16xf32> -> vector<6x16xf32>
    %469 = tpu.concatenate %467, %468 in 1 : vector<6x16xf32>, vector<6x16xf32> -> vector<6x32xf32>
    %470 = vector.extract_strided_slice %469 {offsets = [0, 0], sizes = [2, 32], strides = [1, 1]} : vector<6x32xf32> to vector<2x32xf32>
    %471 = vector.extract_strided_slice %469 {offsets = [2, 0], sizes = [2, 32], strides = [1, 1]} : vector<6x32xf32> to vector<2x32xf32>
    %472 = arith.addf %470, %471 : vector<2x32xf32>
    %473 = vector.extract_strided_slice %469 {offsets = [4, 0], sizes = [2, 32], strides = [1, 1]} : vector<6x32xf32> to vector<2x32xf32>
    %474 = arith.addf %472, %473 : vector<2x32xf32>
    %c0_116 = arith.constant 0 : index
    %c0_117 = arith.constant 0 : index
    %475 = vector.load %arg3[%c0_116, %c0_117] : memref<2x1xf32, #tpu.memory_space<vmem>>, vector<2x1xf32>
    %476 = vector.broadcast %475 : vector<2x1xf32> to vector<2x32xf32>
    %477 = arith.mulf %474, %476 : vector<2x32xf32>
    %c0_118 = arith.constant 0 : index
    %c0_119 = arith.constant 0 : index
    %478 = vector.load %arg16[%c0_118, %c0_119] : memref<32x8xbf16, #tpu.memory_space<vmem>>, vector<32x8xbf16>
    %479 = arith.truncf %477 : vector<2x32xf32> to vector<2x32xbf16>
    %cst_120 = arith.constant dense<0.000000e+00> : vector<2x8xf32>
    %480 = tpu.matmul %479, %478, %cst_120 {dimension_numbers = #tpu.dot_dimension_numbers<[1], [0], [0], [1], [0, 0, 1, 1], [], []>} : vector<2x32xbf16>, vector<32x8xbf16>, vector<2x8xf32> -> vector<2x8xf32>
    %c0_121 = arith.constant 0 : index
    %c0_122 = arith.constant 0 : index
    %481 = vector.load %arg17[%c0_121, %c0_122] : memref<1x8xf32, #tpu.memory_space<vmem>>, vector<1x8xf32>
    %482 = vector.broadcast %481 : vector<1x8xf32> to vector<2x8xf32>
    %483 = arith.addf %480, %482 : vector<2x8xf32>
    %484 = math.tanh %483 : vector<2x8xf32>
    %c0_123 = arith.constant 0 : index
    %c0_124 = arith.constant 0 : index
    %485 = vector.load %arg18[%c0_123, %c0_124] : memref<8x5xbf16, #tpu.memory_space<vmem>>, vector<8x5xbf16>
    %486 = arith.truncf %484 : vector<2x8xf32> to vector<2x8xbf16>
    %cst_125 = arith.constant dense<0.000000e+00> : vector<2x5xf32>
    %487 = tpu.matmul %486, %485, %cst_125 {dimension_numbers = #tpu.dot_dimension_numbers<[1], [0], [0], [1], [0, 0, 1, 1], [], []>} : vector<2x8xbf16>, vector<8x5xbf16>, vector<2x5xf32> -> vector<2x5xf32>
    %c0_126 = arith.constant 0 : index
    %c0_127 = arith.constant 0 : index
    %488 = vector.load %arg19[%c0_126, %c0_127] : memref<1x5xf32, #tpu.memory_space<vmem>>, vector<1x5xf32>
    %489 = vector.broadcast %488 : vector<1x5xf32> to vector<2x5xf32>
    %490 = arith.addf %487, %489 : vector<2x5xf32>
    %491 = arith.negf %490 : vector<2x5xf32>
    %492 = math.exp %491 : vector<2x5xf32>
    %cst_128 = arith.constant 1.000000e+00 : f32
    %493 = vector.broadcast %cst_128 : f32 to vector<2x5xf32>
    %494 = arith.addf %493, %492 : vector<2x5xf32>
    %495 = arith.divf %493, %494 : vector<2x5xf32>
    %c0_129 = arith.constant 0 : index
    %c0_130 = arith.constant 0 : index
    %496 = vector.load %arg20[%c0_129, %c0_130] : memref<2x5xf32, #tpu.memory_space<vmem>>, vector<2x5xf32>
    tpu.vector_store %arg20[%c0_129, %c0_130], %495 {strides = array<i32>} : memref<2x5xf32, #tpu.memory_space<vmem>>, vector<2x5xf32>,
    return
  }
}

</mosaic_0001>

<bundles_post_ra>
// kernel: forward.1
= control target key start
LH: loop header
LB: loop body
LE: loop exit
PB: predicated region body
PF: predicated region fallthrough
CT: control target
= control target key end

     0   :  { %s1891_s0 = inlined_call_operand.vmem [shape: bf16[14,68], index: 0, kind: input, shape index: {}]   ;;  %s1892_s1 = inlined_call_operand.vmem [shape: bf16[14,68], index: 1, kind: input, shape index: {}]   ;;  %s1893_s2 = inlined_call_operand.vmem [shape: bf16[14,68], index: 2, kind: input, shape index: {}]   ;;  %s1894_s3 = inlined_call_operand.vmem [shape: f32[2,1], index: 3, kind: input, shape index: {}]   ;;  %s1895_s4 = inlined_call_operand.vmem [shape: bf16[3,68,8], index: 4, kind: input, shape index: {}]   ;;  %s1896_s5 = inlined_call_operand.vmem [shape: f32[1,8], index: 5, kind: input, shape index: {}]   ;;  %s1897_s6 = inlined_call_operand.vmem [shape: bf16[3,8,32], index: 6, kind: input, shape index: {}]   ;;  %s1898_s7 = inlined_call_operand.vmem [shape: f32[1,32], index: 7, kind: input, shape index: {}]   ;;  %s1899_s8 = inlined_call_operand.vmem [shape: bf16[32,96], index: 8, kind: input, shape index: {}]   ;;  %s1900_s9 = inlined_call_operand.vmem [shape: f32[1,96], index: 9, kind: input, shape index: {}]   ;;  %s1901_s10 = inlined_call_operand.vmem [shape: bf16[32,96], index: 10, kind: input, shape index: {}]   ;;  %s1902_s11 = inlined_call_operand.vmem [shape: f32[1,96], index: 11, kind: input, shape index: {}]   ;;  %s1903_s12 = inlined_call_operand.vmem [shape: bf16[32,96], index: 12, kind: input, shape index: {}]   ;;  %s1904_s13 = inlined_call_operand.vmem [shape: f32[1,96], index: 13, kind: input, shape index: {}]   ;;  %s1905_s14 = inlined_call_operand.vmem [shape: bf16[32,96], index: 14, kind: input, shape index: {}]   ;;  %s1906_s15 = inlined_call_operand.vmem [shape: f32[1,96], index: 15, kind: input, shape index: {}]   ;;  %s1907_s16 = inlined_call_operand.vmem [shape: bf16[32,8], index: 16, kind: input, shape index: {}]   ;;  %s1908_s17 = inlined_call_operand.vmem [shape: f32[1,8], index: 17, kind: input, shape index: {}]   ;;  %s1909_s18 = inlined_call_operand.vmem [shape: bf16[8,5], index: 18, kind: input, shape index: {}]   ;;  %s1910_s19 = inlined_call_operand.vmem [shape: f32[1,5], index: 19, kind: input, shape index: {}]   ;;  %s1911_s20 = inlined_call_operand.hbm [shape: f32[2,5], index: 20, kind: output, shape index: {}]  }
   0x1   :  { %1916 = sst [smem:[#allocation5_spill]] %s1891_s0 }
   0x2   :  { %1917 = sst [smem:[#allocation6_spill]] %s1892_s1 }
   0x3   :  { %1918 = sst [smem:[#allocation7_spill]] %s1893_s2 }
   0x4   :  { %1919 = sst [smem:[#allocation8_spill]] %s1894_s3 }
   0x5   :  { %1920 = sst [smem:[#allocation9_spill]] %s1895_s4 }
   0x6   :  { %s1921_s23 = sld [smem:[#allocation9_spill]]  ;;  %vm126_vm0 = vcmask 1041408  }
   0xc   :  { %v1205_v0 = vld [vmem:[%s1921_s23 + $0x44] sm:$0x3]  ;;  %v77_v1 = vld [vmem:[%s1921_s23 + $0x20] sm:$0x3]  ;;  %v1256_v4 = vld [vmem:[%s1921_s23 + $0x68] sm:$0x3] }
   0xd   :  { %v112_v2 = vunpack.c.l.b16 %v1205_v0  ;;  %v166_v3 = vunpack.c.l.b16 %v77_v1  ;;  %v230_v5 = vunpack.c.l.b16 %v1256_v4  ;;  %v1351_v12 = vld [vmem:[%s1921_s23 + $0x3c] sm:$0xff]  ;;  %v1350_v15 = vld [vmem:[%s1921_s23 + $0x34] sm:$0xff] }
   0xe   :  { %v1346_v13 = vld [vmem:[%s1921_s23 + $0x18] sm:$0xff]  ;;  %v1356_v14 = vld [vmem:[%s1921_s23 + $0x60] sm:$0xff]  ;;  %v1345_v16 = vld [vmem:[%s1921_s23 + $0x10] sm:$0xff] }
   0xf   :  { %v117_v6 = vpack.c.b16 %v112_v2, %v112_v2  ;;  %v171_v7 = vpack.c.b16 %v166_v3, %v166_v3  ;;  %v235_v8 = vpack.c.b16 %v230_v5, %v230_v5 }
  0x11   :  { %v128_v9 = vsel %vm126_vm0, %v117_v6, 0  ;;  %v180_v10 = vsel %vm126_vm0, %v171_v7, 0  ;;  %v244_v11 = vsel %vm126_vm0, %v235_v8, 0 }
  0x12   :  { %133 = vmatpush.bf16.msra.mxu0 %v128_v9  ;;  %185 = vmatpush.bf16.msra.mxu1 %v180_v10 }
  0x13   :  { %249 = vmatpush.bf16.msra.mxu2 %v244_v11 }
  0x16   :  { %134 = vmatpush.bf16.msra.mxu0 %v1351_v12  ;;  %186 = vmatpush.bf16.msra.mxu1 %v1346_v13 }
  0x17   :  { %25 = vsyncpa [#allocation3], 0  ;;  %250 = vmatpush.bf16.msra.mxu2 %v1356_v14  ;;  %v1355_v17 = vld [vmem:[%s1921_s23 + $0x58] sm:$0xff]  ;;  %v1349_v18 = vld [vmem:[%s1921_s23 + $0x2c] sm:$0xff]  ;;  %s1922_s24 = sld [smem:[#allocation6_spill]]  ;;  %vm122_vm1 = vcmask 556032  }
  0x18   :  { %v1344_v19 = vld [vmem:[%s1921_s23 + $0x8] sm:$0xff]  ;;  %v1354_v20 = vld [vmem:[%s1921_s23 + $0x50] sm:$0xff]  ;;  %v1343_v22 = vld [vmem:[%s1921_s23] sm:$0xff]  ;;  %s1923_s27 = sld [smem:[#allocation5_spill]]  ;;  %vm276_vm2 = vcmask 1043456   ;;  %v1477_v44 = vmov 0  }
  0x19   :  { %v1348_v21 = vld [vmem:[%s1921_s23 + $0x24] sm:$0xff]  ;;  %s1924_s1 = sld [smem:[#allocation7_spill]]  ;;  %v270_v33 = vld [vmem:[%s1897_s6] sm:$0xf]  ;;  %1375 = vset.pattern.permute.xlu2 %v1477_v44  ;;  %1376 = vset.pattern.permute.xlu0 %v1477_v44  ;;  %vm272_vm3 = vcmask 64512   ;;  %vm387_vm4 = vcmask 261120  }
  0x1a   :  { %135 = vmatpush.bf16.msra.mxu0 %v1350_v15  ;;  %187 = vmatpush.bf16.msra.mxu1 %v1345_v16  ;;  %v1353_v27 = vld [vmem:[%s1921_s23 + $0x48] sm:$0xff]  ;;  %v278_v35 = vsel %vm276_vm2, %v270_v33, 0  ;;  %v1279_v37 = vld [vmem:[%s1897_s6 + $0x4] sm:$0xf]  ;;  %v1377_v49 = vld [vmem:[%s1896_s5] ss:$0 sm:$0xff] }
  0x1b   :  { %251 = vmatpush.bf16.msra.mxu2 %v1355_v17  ;;  %v1281_v34 = vld [vmem:[%s1897_s6 + $0x8] sm:$0xf]  ;;  %287 = vmatpush.bf16.msra.mxu3 %v278_v35  ;;  %v297_v38 = vsel %vm276_vm2, %v1279_v37, 0  ;;  %v1359_v45 = vld [vmem:[%s1901_s10] sm:$0xff]  ;;  %s1481_s3 = smov 80   ;;  %vm528_vm13 = vcmask 130048  }
  0x1c   :  { %v316_v36 = vsel %vm276_vm2, %v1281_v34, 0  ;;  %v1360_v43 = vld [vmem:[%s1901_s10 + $0x8] sm:$0xff]  ;;  %v1357_v60 = vld [vmem:[%s1899_s8] sm:$0xff]  ;;  %s1482_s26 = smov 16   ;;  %s1925_s22 = sld [smem:[#allocation8_spill]] }
  0x1d   :  { %v1208_v23 = vld [vmem:[%s1922_s24] sm:$0xf]  ;;  %v1347_v24 = vld [vmem:[%s1922_s24] sm:$0x70]  ;;  %v1358_v58 = vld [vmem:[%s1899_s8 + $0x8] sm:$0xff]  ;;  %s1478_s24 = smov 96  }
  0x1e   :  { %136 = vmatpush.bf16.msra.mxu0 %v1349_v18  ;;  %188 = vmatpush.bf16.msra.mxu1 %v1344_v19  ;;  %v1229_v25 = vld [vmem:[%s1923_s27] sm:$0xf]  ;;  %v1342_v26 = vld [vmem:[%s1923_s27] sm:$0x70]  ;;  %v1209_v30 = vor.u32 %v1347_v24, %v1208_v23  ;;  %s1483_s27 = smov 48  }
  0x1f   :  { %252 = vmatpush.bf16.msra.mxu2 %v1354_v20  ;;  %v1259_v28 = vld [vmem:[%s1924_s1] sm:$0xf]  ;;  %v1352_v29 = vld [vmem:[%s1924_s1] sm:$0x70]  ;;  %v1230_v31 = vor.u32 %v1342_v26, %v1229_v25  ;;  %306 = vmatpush.bf16.msrb.mxu3 %v297_v38 }
  0x20   :  { %v1260_v32 = vor.u32 %v1352_v29, %v1259_v28  ;;  %v1692_v61 = vld [vmem:[%s1902_s11] ss:$0 sm:$0xff]  ;;  %s1480_s11 = smov 112  }
  0x21   :  { %v1378_v3 = vld [vmem:[%s1898_s7] ss:$0 sm:$0xff] }
  0x22   :  { %137 = vmatpush.bf16.msra.mxu0 %v1348_v21  ;;  %189 = vmatpush.bf16.msra.mxu1 %v1343_v22 }
  0x23   :  { %253 = vmatpush.bf16.msra.mxu2 %v1353_v27  ;;  %v1380_v27 = vld [vmem:[%s1900_s9] ss:$0 sm:$0xff]  ;;  %s1479_s9 = smov 32  }
  0x25   :  { %1226 = vmatmul.msk.bf16.vlgmr.msra.gmra.mxu0 %vm122_vm1, %v1209_v30  ;;  %1247 = vmatmul.msk.bf16.vlgmr.msra.gmra.mxu1 %vm122_vm1, %v1230_v31 }
  0x26   :  { %1277 = vmatmul.msk.bf16.vlgmr.msra.gmra.mxu2 %vm122_vm1, %v1260_v32  ;;  %325 = vmatpush.bf16.msrb.mxu0 %v316_v36 }
  0x27   :  { %433 = vmatpush.bf16.msrb.mxu2 %v1360_v43  ;;  %397 = vmatpush.bf16.msrb.mxu1 %v1358_v58 }
  0x2a   :  { %619 = vmatpush.bf16.msra.mxu0 %v1360_v43 }
  0x2b   :  { %434 = vmatpush.bf16.msrb.mxu2 %v1359_v45  ;;  %398 = vmatpush.bf16.msrb.mxu1 %v1357_v60 }
  0x2e   :  { %620 = vmatpush.bf16.msra.mxu0 %v1359_v45 }
  0x36   :  { %435 = vmatmul.bf16.vlgmr.msrb.gmra.mxu2 %v1477_v44 }
  0xa2   :  { %v139_v39 = vpop.f32.mrf.mxu0  ;;  %v191_v40 = vpop.f32.mrf.mxu1 }
  0xa3   :  { %v192_v42 = vadd.f32 %v191_v40, %v139_v39 }
  0xa9   :  { %v255_v41 = vpop.f32.mrf.mxu2 }
  0xaa   :  { %v141_v46 = vpop.f32.mrf.mxu0  ;;  %v193_v47 = vpop.f32.mrf.mxu1  ;;  %v260_v48 = vadd.f32 %v255_v41, %v192_v42 }
  0xab   :  { %v194_v50 = vadd.f32 %v193_v47, %v141_v46 }
  0xac   :  { %v266_v52 = vadd.f32 %v1377_v49, %v260_v48 }
  0xae   :  { %v268_v55 = vmax.f32 %v266_v52, 0.0 }
  0xb1   :  { %v257_v51 = vpop.f32.mrf.mxu2 }
  0xb2   :  { %v261_v53 = vadd.f32 %v257_v51, %v194_v50 }
  0xb4   :  { %v267_v54 = vadd.f32 %v1377_v49, %v261_v53 }
  0xb6   :  { %v269_v56 = vmax.f32 %v267_v54, 0.0 }
  0xb8   :  { %v271_v57 = vpack.c.bf16 %v269_v56, %v268_v55 }
  0xb9   :  { %v436_v62 = vpop.f32.mrf.mxu2 }
  0xba   :  { %1278 = vmatmul.msk.bf16.vlgmr.msra.gmra.mxu3 %vm272_vm3, %v271_v57  ;;  %1282 = vmatmul.msk.bf16.vlgmr.msrb.gmra.mxu0 %vm272_vm3, %v271_v57  ;;  %v437_v1 = vadd.f32 %v1692_v61, %v436_v62 }
  0xbb   :  { %540 = vmatpush.bf16.msra.mxu3 %v1360_v43 }
  0xbc   :  { %v479_v2 = vrot.slane %v437_v1, 4 }
  0xbe   :  { %501 = vrot.lane.b32.xlu0 %v479_v2, %s1478_s24 }
  0xbf   :  { %541 = vmatpush.bf16.msra.mxu3 %v1359_v45 }
  0xc1   :  { %v438_v4 = vpop.f32.mrf.mxu2 }
  0xc6   :  { %461 = vrot.lane.b32.xlu0 %v437_v1, %s1478_s24 }
  0xca   :  { %1280 = vmatmul.msk.bf16.vlgmr.msrb.gmra.mxu3 %vm272_vm3, %v271_v57 }
 0x130   :  { %v502_v51 = vpop.permute.xlu0 %501 }
 0x137   :  { %v327_v63 = vpop.f32.mrf.mxu0 }
 0x138   :  { %v342_v15 = vrot.slane %v327_v63, 4  ;;  %v462_v63 = vpop.permute.xlu0 %461 }
 0x13d   :  { %v289_v59 = vpop.f32.mrf.mxu3 }
 0x13e   :  { %v336_v6 = vadd.f32 %v1378_v3, %v289_v59 }
 0x13f   :  { %v329_v7 = vpop.f32.mrf.mxu0 }
 0x140   :  { %v347_v10 = vrot.slane %v329_v7, 4 }
 0x145   :  { %v291_v0 = vpop.f32.mrf.mxu3 }
 0x146   :  { %v351_v13 = vadd.f32 %v1378_v3, %v291_v0 }
 0x14d   :  { %v308_v5 = vpop.f32.mrf.mxu3 }
 0x14e   :  { %v338_v8 = vrot.slane %v308_v5, 2 }
 0x150   :  { %v340_v9 = vadd.f32 %v338_v8, %v336_v6 }
 0x152   :  { %v349_v11 = vadd.f32 %v347_v10, %v340_v9  ;;  %v344_v18 = vadd.f32 %v342_v15, %v340_v9 }
 0x154   :  { %v350_v16 = vmax.f32 %v349_v11, 0.0  ;;  %v345_v22 = vmax.f32 %v344_v18, 0.0 }
 0x155   :  { %v310_v12 = vpop.f32.mrf.mxu3 }
 0x156   :  { %v353_v14 = vrot.slane %v310_v12, 2  ;;  %v359_v20 = vrot.slane %v350_v16, 2 }
 0x158   :  { %v355_v17 = vadd.f32 %v353_v14, %v351_v13  ;;  %v364_v24 = vsel %vm126_vm0, %v345_v22, %v359_v20 }
 0x15a   :  { %v356_v19 = vadd.f32 %v355_v17, %v347_v10 }
 0x15c   :  { %v357_v21 = vmax.f32 %v356_v19, 0.0 }
 0x15e   :  { %v362_v23 = vrot.slane %v357_v21, 4 }
 0x160   :  { %v365_v25 = vsel %vm276_vm2, %v364_v24, %v362_v23 }
 0x161   :  { %v370_v26 = vpack.c.bf16 %v365_v25, %v365_v25 }
 0x163   :  { %1291 = vmatmul.msk.bf16.vlgmr.msrb.gmra.mxu1 %vm387_vm4, %v370_v26 }
 0x1e0   :  { %v400_v28 = vpop.f32.mrf.mxu1 }
 0x1e1   :  { %v1706_v29 = vadd.f32 %v1380_v27, %v400_v28 }
 0x1e3   :  { %v481_v30 = vadd.f32 %v479_v2, %v1706_v29  ;;  %v440_v31 = vadd.f32 %v437_v1, %v1706_v29 }
 0x1e5   :  { %v1301_v32 = vmul.f32 -1.442695, %v481_v30  ;;  %v1300_v33 = vmul.f32 -1.442695, %v440_v31 }
 0x1e7   :  { %1385 = vpow2.f32 %v1301_v32 }
 0x1e8   :  { %v402_v34 = vpop.f32.mrf.mxu1  ;;  %1387 = vpow2.f32 %v1300_v33 }
 0x1ed   :  { %v1386_v35 = vpop.eup %1385 }
 0x1ee   :  { %v1388_v36 = vpop.eup %1387  ;;  %v485_v37 = vadd.f32 1.0, %v1386_v35 }
 0x1ef   :  { %v444_v38 = vadd.f32 1.0, %v1388_v36 }
 0x1f0   :  { %1389 = vrcp.f32 %v485_v37  ;;  %v497_v45 = vand.u32 2147483648, %v485_v37  ;;  %v495_v48 = vand.u32 2147483647, %v485_v37  ;;  %vm491_vm6 = vweird.f32 %v485_v37 }
 0x1f1   :  { %1391 = vrcp.f32 %v444_v38  ;;  %v456_v56 = vand.u32 2147483648, %v444_v38  ;;  %vm450_vm10 = vweird.f32 %v444_v38  ;;  %v454_v58 = vand.u32 2147483647, %v444_v38 }
 0x1f2   :  { %v498_v52 = vor.u32 1.1754944e-38, %v497_v45  ;;  %vm496_vm8 = vcmp.eq.f32.partialorder %v495_v48, 8.507059e+37 }
 0x1f3   :  { %v457_v60 = vor.u32 1.1754944e-38, %v456_v56  ;;  %vm455_vm12 = vcmp.eq.f32.partialorder %v454_v58, 8.507059e+37 }
 0x1f6   :  { %v1390_v39 = vpop.eup %1389 }
 0x1f7   :  { %v1392_v40 = vpop.eup %1391  ;;  %v487_v41 = vmul.f32 %v1390_v39, %v485_v37  ;;  %vm492_vm5 = vweird.f32 %v1390_v39 }
 0x1f8   :  { %v446_v42 = vmul.f32 %v1392_v40, %v444_v38  ;;  %vm493_vm7 = vmor %vm491_vm6, %vm492_vm5  ;;  %vm451_vm9 = vweird.f32 %v1392_v40 }
 0x1f9   :  { %v488_v43 = vsub.f32 1.0, %v487_v41  ;;  %vm452_vm11 = vmor %vm450_vm10, %vm451_vm9 }
 0x1fa   :  { %v447_v46 = vsub.f32 1.0, %v446_v42 }
 0x1fb   :  { %v489_v47 = vmul.f32 %v1390_v39, %v488_v43 }
 0x1fc   :  { %v448_v49 = vmul.f32 %v1392_v40, %v447_v46 }
 0x1fd   :  { %v490_v50 = vadd.f32 %v1390_v39, %v489_v47 }
 0x1fe   :  { %v449_v54 = vadd.f32 %v1392_v40, %v448_v49 }
 0x1ff   :  { %v494_v53 = vsel %vm493_vm7, %v1390_v39, %v490_v50 }
 0x200   :  { %v499_v55 = vsel %vm496_vm8, %v498_v52, %v494_v53  ;;  %v453_v59 = vsel %vm452_vm11, %v1392_v40, %v449_v54 }
 0x201   :  { %v504_v57 = vmul.f32 %v502_v51, %v499_v55  ;;  %v458_v62 = vsel %vm455_vm12, %v457_v60, %v453_v59  ;;  %v511_v7 = vsub.f32 1.0, %v499_v55  ;;  %v517_v9 = vmul.f32 0.0, %v499_v55 }
 0x202   :  { %v464_v0 = vmul.f32 %v462_v63, %v458_v62  ;;  %v471_v13 = vsub.f32 1.0, %v458_v62  ;;  %v477_v15 = vmul.f32 0.0, %v458_v62 }
 0x203   :  { %506 = vrot.lane.b32.xlu1 %v504_v57, %s1479_s9 }
 0x20b   :  { %466 = vrot.lane.b32.xlu1 %v464_v0, %s1479_s9 }
 0x275   :  { %v507_v1 = vpop.permute.xlu1 %506 }
 0x276   :  { %v509_v2 = vadd.f32 %v507_v1, %v1706_v29 }
 0x278   :  { %1393 = vtanh.f32 %v509_v2 }
 0x27d   :  { %v467_v3 = vpop.permute.xlu1 %466 }
 0x27e   :  { %v1394_v4 = vpop.eup %1393  ;;  %v469_v5 = vadd.f32 %v467_v3, %v1706_v29 }
 0x27f   :  { %513 = vrot.lane.b32.xlu2 %v1394_v4, %s1480_s11 }
 0x280   :  { %1395 = vtanh.f32 %v469_v5 }
 0x286   :  { %v1396_v6 = vpop.eup %1395 }
 0x287   :  { %473 = vrot.lane.b32.xlu2 %v1396_v6, %s1480_s11 }
 0x2d9   :  { %v514_v8 = vpop.permute.xlu2 %513 }
 0x2da   :  { %v516_v10 = vmul.f32 %v514_v8, %v511_v7 }
 0x2dc   :  { %v1716_v11 = vadd.f32 %v517_v9, %v516_v10 }
 0x2de   :  { %v524_v12 = vrot.slane %v1716_v11, 4 }
 0x2e0   :  { %525 = vrot.lane.b32.xlu1 %v524_v12, %s1481_s3 }
 0x2e1   :  { %v474_v14 = vpop.permute.xlu2 %473 }
 0x2e2   :  { %v476_v16 = vmul.f32 %v474_v14, %v471_v13 }
 0x2e4   :  { %v1720_v17 = vadd.f32 %v477_v15, %v476_v16 }
 0x2e6   :  { %520 = vrot.lane.b32.xlu0 %v1720_v17, %s1480_s11 }
 0x352   :  { %v526_v18 = vpop.permute.xlu1 %525 }
 0x358   :  { %v521_v19 = vpop.permute.xlu0 %520 }
 0x359   :  { %v529_v20 = vsel %vm528_vm13, %v521_v19, %v526_v18 }
 0x35a   :  { %v530_v21 = vpack.c.bf16 %v529_v20, %v529_v20  ;;  %v587_v26 = vrot.slane %v529_v20, 6 }
 0x35c   :  { %1302 = vmatmul.msk.bf16.vlgmr.msra.gmra.mxu3 %vm387_vm4, %v530_v21 }
 0x3df   :  { %v543_v22 = vpop.f32.mrf.mxu3 }
 0x3e0   :  { %v544_v23 = vadd.f32 %v1692_v61, %v543_v22 }
 0x3e2   :  { %v548_v24 = vrot.slane %v544_v23, 6 }
 0x3e4   :  { %570 = vrot.lane.b32.xlu2 %v548_v24, %s1478_s24  ;;  %v550_v27 = vadd.f32 %v548_v24, %v1706_v29 }
 0x3e6   :  { %v1303_v28 = vmul.f32 -1.442695, %v550_v27 }
 0x3e7   :  { %v545_v25 = vpop.f32.mrf.mxu3 }
 0x3e8   :  { %1397 = vpow2.f32 %v1303_v28 }
 0x3ec   :  { %588 = vrot.lane.b32.xlu2 %v587_v26, %s1482_s26 }
 0x3ee   :  { %v1398_v30 = vpop.eup %1397 }
 0x3ef   :  { %v554_v31 = vadd.f32 1.0, %v1398_v30 }
 0x3f1   :  { %1399 = vrcp.f32 %v554_v31  ;;  %v566_v37 = vand.u32 2147483648, %v554_v31  ;;  %vm560_vm15 = vweird.f32 %v554_v31  ;;  %v564_v38 = vand.u32 2147483647, %v554_v31 }
 0x3f3   :  { %v567_v40 = vor.u32 1.1754944e-38, %v566_v37  ;;  %vm565_vm5 = vcmp.eq.f32.partialorder %v564_v38, 8.507059e+37 }
 0x3f7   :  { %v1400_v32 = vpop.eup %1399 }
 0x3f8   :  { %v556_v33 = vmul.f32 %v1400_v32, %v554_v31  ;;  %vm561_vm14 = vweird.f32 %v1400_v32 }
 0x3f9   :  { %vm562_vm1 = vmor %vm560_vm15, %vm561_vm14 }
 0x3fa   :  { %v557_v34 = vsub.f32 1.0, %v556_v33 }
 0x3fc   :  { %v558_v35 = vmul.f32 %v1400_v32, %v557_v34 }
 0x3fe   :  { %v559_v36 = vadd.f32 %v1400_v32, %v558_v35 }
 0x400   :  { %v563_v39 = vsel %vm562_vm1, %v1400_v32, %v559_v36 }
 0x401   :  { %v568_v42 = vsel %vm565_vm5, %v567_v40, %v563_v39 }
 0x402   :  { %v580_v50 = vsub.f32 1.0, %v568_v42 }
 0x43e   :  { %v571_v41 = vpop.permute.xlu2 %570 }
 0x43f   :  { %v573_v43 = vmul.f32 %v571_v41, %v568_v42 }
 0x441   :  { %575 = vrot.lane.b32.xlu0 %v573_v43, %s1479_s9 }
 0x446   :  { %v589_v48 = vpop.permute.xlu2 %588 }
 0x447   :  { %v591_v52 = vmul.f32 %v589_v48, %v568_v42 }
 0x449   :  { %593 = vrot.lane.b32.xlu0 %v587_v26, %s1483_s27 }
 0x4b3   :  { %v576_v45 = vpop.permute.xlu0 %575 }
 0x4b4   :  { %v578_v46 = vadd.f32 %v576_v45, %v1706_v29 }
 0x4b6   :  { %1401 = vtanh.f32 %v578_v46  ;;  %v1364_v46 = vld [vmem:[%s1905_s14 + $0x8] sm:$0xff] }
 0x4b7   :  { %790 = vmatpush.bf16.msra.mxu2 %v1364_v46  ;;  %896 = vmatpush.bf16.msrb.mxu3 %v1364_v46 }
 0x4b8   :  { %975 = vmatpush.bf16.msrb.mxu0 %v1364_v46 }
 0x4bb   :  { %v594_v49 = vpop.permute.xlu0 %593 }
 0x4bc   :  { %v1402_v47 = vpop.eup %1401  ;;  %v596_v53 = vmul.f32 %v594_v49, %v568_v42 }
 0x4bd   :  { %582 = vrot.lane.b32.xlu1 %v1402_v47, %s1480_s11  ;;  %v1363_v47 = vld [vmem:[%s1905_s14] sm:$0xff] }
 0x4be   :  { %791 = vmatpush.bf16.msra.mxu2 %v1363_v47  ;;  %897 = vmatpush.bf16.msrb.mxu3 %v1363_v47 }
 0x4bf   :  { %976 = vmatpush.bf16.msrb.mxu0 %v1363_v47 }
 0x4c1   :  { %792 = vmatmul.bf16.vlgmr.msra.gmra.mxu2 %v1477_v44 }
 0x52f   :  { %v583_v51 = vpop.permute.xlu1 %582 }
 0x530   :  { %v585_v54 = vmul.f32 %v583_v51, %v580_v50  ;;  %v1362_v50 = vld [vmem:[%s1903_s12 + $0x8] sm:$0xff] }
 0x531   :  { %757 = vmatpush.bf16.msra.mxu1 %v1362_v50 }
 0x532   :  { %v1734_v55 = vadd.f32 %v591_v52, %v585_v54  ;;  %v1736_v56 = vadd.f32 %v596_v53, %v585_v54  ;;  %v1361_v53 = vld [vmem:[%s1903_s12] sm:$0xff] }
 0x534   :  { %599 = vrot.lane.b32.xlu1 %v1734_v55, %s1480_s11  ;;  %603 = vrot.lane.b32.xlu2 %v1736_v56, %s1481_s3 }
 0x535   :  { %758 = vmatpush.bf16.msra.mxu1 %v1361_v53 }
 0x58e   :  { %v604_v57 = vpop.permute.xlu2 %603 }
 0x5a6   :  { %v600_v58 = vpop.permute.xlu1 %599 }
 0x5a7   :  { %v1743_v59 = vsel %vm528_vm13, %v600_v58, %v604_v57 }
 0x5a8   :  { %v607_v60 = vpack.c.bf16 %v1743_v59, %v1743_v59  ;;  %v708_v37 = vrot.slane %v1743_v59, 2  ;;  %v666_v41 = vrot.slane %v1743_v59, 6 }
 0x5aa   :  { %v609_v62 = vrot.slane %v607_v60, 1 }
 0x5ac   :  { %1304 = vmatmul.msk.bf16.vlgmr.msra.gmra.mxu0 %vm387_vm4, %v609_v62 }
 0x629   :  { %v622_v63 = vpop.f32.mrf.mxu0 }
 0x62a   :  { %v623_v0 = vadd.f32 %v1692_v61, %v622_v63 }
 0x62c   :  { %692 = vrot.lane.b32.xlu0 %v623_v0, %s1478_s24  ;;  %v627_v1 = vrot.slane %v623_v0, 4  ;;  %v672_v3 = vadd.f32 %v623_v0, %v1706_v29 }
 0x62e   :  { %649 = vrot.lane.b32.xlu1 %v627_v1, %s1478_s24  ;;  %v629_v4 = vadd.f32 %v627_v1, %v1706_v29  ;;  %v1306_v5 = vmul.f32 -1.442695, %v672_v3  ;;  %v714_v1 = vsel %vm126_vm0, %v1720_v17, %v1734_v55 }
 0x630   :  { %v1305_v6 = vmul.f32 -1.442695, %v629_v4  ;;  %1403 = vpow2.f32 %v1306_v5  ;;  %v1791_v5 = vld [vmem:[%s1906_s15] ss:$0 sm:$0xff] }
 0x631   :  { %v624_v2 = vpop.f32.mrf.mxu0 }
 0x632   :  { %1405 = vpow2.f32 %v1305_v6  ;;  %v793_v6 = vpop.f32.mrf.mxu2 }
 0x636   :  { %v1404_v7 = vpop.eup %1403 }
 0x637   :  { %v676_v9 = vadd.f32 1.0, %v1404_v7  ;;  %v794_v7 = vadd.f32 %v1791_v5, %v793_v6 }
 0x638   :  { %v1406_v8 = vpop.eup %1405 }
 0x639   :  { %v633_v10 = vadd.f32 1.0, %v1406_v8  ;;  %1407 = vrcp.f32 %v676_v9  ;;  %v688_v21 = vand.u32 2147483648, %v676_v9  ;;  %vm682_vm7 = vweird.f32 %v676_v9  ;;  %v1382_v8 = vld [vmem:[%s1904_s13] ss:$0 sm:$0xff] }
 0x63a   :  { %v686_v22 = vand.u32 2147483647, %v676_v9  ;;  %v836_v17 = vrot.slane %v794_v7, 4  ;;  %v795_v55 = vpop.f32.mrf.mxu2 }
 0x63b   :  { %1409 = vrcp.f32 %v633_v10  ;;  %v645_v24 = vand.u32 2147483648, %v633_v10  ;;  %vm639_vm10 = vweird.f32 %v633_v10  ;;  %v643_v26 = vand.u32 2147483647, %v633_v10 }
 0x63c   :  { %v689_v27 = vor.u32 1.1754944e-38, %v688_v21  ;;  %vm687_vm12 = vcmp.eq.f32.partialorder %v686_v22, 8.507059e+37 }
 0x63d   :  { %v646_v32 = vor.u32 1.1754944e-38, %v645_v24  ;;  %vm644_vm14 = vcmp.eq.f32.partialorder %v643_v26, 8.507059e+37 }
 0x63f   :  { %v1408_v61 = vpop.eup %1407 }
 0x640   :  { %v678_v13 = vmul.f32 %v1408_v61, %v676_v9  ;;  %vm683_vm6 = vweird.f32 %v1408_v61 }
 0x641   :  { %v1410_v12 = vpop.eup %1409  ;;  %vm684_vm9 = vmor %vm682_vm7, %vm683_vm6 }
 0x642   :  { %v635_v14 = vmul.f32 %v1410_v12, %v633_v10  ;;  %v679_v15 = vsub.f32 1.0, %v678_v13  ;;  %vm640_vm8 = vweird.f32 %v1410_v12 }
 0x643   :  { %vm641_vm11 = vmor %vm639_vm10, %vm640_vm8 }
 0x644   :  { %v636_v16 = vsub.f32 1.0, %v635_v14  ;;  %v680_v18 = vmul.f32 %v1408_v61, %v679_v15 }
 0x646   :  { %v637_v19 = vmul.f32 %v1410_v12, %v636_v16  ;;  %v681_v20 = vadd.f32 %v1408_v61, %v680_v18 }
 0x648   :  { %v638_v23 = vadd.f32 %v1410_v12, %v637_v19  ;;  %v685_v25 = vsel %vm684_vm9, %v1408_v61, %v681_v20 }
 0x649   :  { %v690_v31 = vsel %vm687_vm12, %v689_v27, %v685_v25 }
 0x64a   :  { %v642_v28 = vsel %vm641_vm11, %v1410_v12, %v638_v23  ;;  %v702_v49 = vsub.f32 1.0, %v690_v31 }
 0x64b   :  { %v647_v35 = vsel %vm644_vm14, %v646_v32, %v642_v28 }
 0x64c   :  { %v659_v60 = vsub.f32 1.0, %v647_v35 }
 0x69e   :  { %v693_v30 = vpop.permute.xlu0 %692 }
 0x69f   :  { %v695_v33 = vmul.f32 %v693_v30, %v690_v31 }
 0x6a0   :  { %v650_v34 = vpop.permute.xlu1 %649 }
 0x6a1   :  { %v652_v36 = vmul.f32 %v650_v34, %v647_v35  ;;  %697 = vrot.lane.b32.xlu2 %v695_v33, %s1479_s9 }
 0x6a3   :  { %654 = vrot.lane.b32.xlu0 %v652_v36, %s1479_s9 }
 0x6a9   :  { %709 = vrot.lane.b32.xlu2 %v708_v37, %s1483_s27 }
 0x6fb   :  { %v698_v38 = vpop.permute.xlu2 %697 }
 0x6fc   :  { %v700_v39 = vadd.f32 %v698_v38, %v1706_v29 }
 0x6fe   :  { %1411 = vtanh.f32 %v700_v39 }
 0x703   :  { %v710_v48 = vpop.permute.xlu2 %709 }
 0x704   :  { %v1412_v40 = vpop.eup %1411  ;;  %v712_v51 = vmul.f32 %v710_v48, %v690_v31 }
 0x705   :  { %704 = vrot.lane.b32.xlu1 %v1412_v40, %s1480_s11 }
 0x70d   :  { %667 = vrot.lane.b32.xlu1 %v666_v41, %s1482_s26 }
 0x715   :  { %v655_v42 = vpop.permute.xlu0 %654  ;;  %858 = vrot.lane.b32.xlu1 %v836_v17, %s1478_s24 }
 0x716   :  { %v657_v43 = vadd.f32 %v655_v42, %v1706_v29 }
 0x718   :  { %1413 = vtanh.f32 %v657_v43 }
 0x71e   :  { %v1414_v45 = vpop.eup %1413 }
 0x71f   :  { %661 = vrot.lane.b32.xlu0 %v1414_v45, %s1480_s11 }
 0x777   :  { %v705_v29 = vpop.permute.xlu1 %704 }
 0x778   :  { %v707_v52 = vmul.f32 %v705_v29, %v702_v49 }
 0x77a   :  { %v713_v54 = vadd.f32 %v712_v51, %v707_v52 }
 0x77c   :  { %v716_v57 = vsel %vm126_vm0, %v713_v54, %v1736_v56 }
 0x77d   :  { %v717_v58 = vsel %vm276_vm2, %v716_v57, %v1716_v11 }
 0x77e   :  { %723 = vrot.lane.b32.xlu0 %v717_v58, %s1481_s3 }
 0x77f   :  { %v668_v59 = vpop.permute.xlu1 %667 }
 0x780   :  { %v670_v63 = vmul.f32 %v668_v59, %v647_v35 }
 0x787   :  { %v859_v35 = vpop.permute.xlu1 %858 }
 0x791   :  { %v662_v62 = vpop.permute.xlu0 %661 }
 0x792   :  { %v664_v44 = vmul.f32 %v662_v62, %v659_v60 }
 0x794   :  { %v671_v0 = vadd.f32 %v670_v63, %v664_v44 }
 0x796   :  { %v715_v2 = vsel %vm276_vm2, %v714_v1, %v671_v0 }
 0x797   :  { %719 = vrot.lane.b32.xlu2 %v715_v2, %s1480_s11 }
 0x79f   :  { %818 = vrot.lane.b32.xlu2 %v794_v7, %s1478_s24 }
 0x7f0   :  { %v724_v56 = vpop.permute.xlu0 %723 }
 0x7f1   :  { %v720_v3 = vpop.permute.xlu2 %719 }
 0x7f2   :  { %v726_v11 = vsel %vm528_vm13, %v720_v3, %v724_v56 }
 0x7f3   :  { %v731_v4 = vpack.c.bf16 %v726_v11, %v726_v11 }
 0x7f5   :  { %1315 = vmatmul.msk.bf16.vlgmr.msra.gmra.mxu1 %vm387_vm4, %v731_v4 }
 0x7f9   :  { %v819_v39 = vpop.permute.xlu2 %818 }
 0x872   :  { %v760_v9 = vpop.f32.mrf.mxu1 }
 0x873   :  { %v1799_v10 = vadd.f32 %v1382_v8, %v760_v9 }
 0x875   :  { %v838_v61 = vadd.f32 %v836_v17, %v1799_v10  ;;  %v797_v12 = vadd.f32 %v794_v7, %v1799_v10 }
 0x877   :  { %v1325_v13 = vmul.f32 -1.442695, %v838_v61  ;;  %v1324_v14 = vmul.f32 -1.442695, %v797_v12 }
 0x879   :  { %1415 = vpow2.f32 %v1325_v13 }
 0x87a   :  { %v762_v15 = vpop.f32.mrf.mxu1  ;;  %1417 = vpow2.f32 %v1324_v14 }
 0x87f   :  { %v1416_v16 = vpop.eup %1415 }
 0x880   :  { %v1418_v18 = vpop.eup %1417  ;;  %v842_v19 = vadd.f32 1.0, %v1416_v16 }
 0x881   :  { %v801_v20 = vadd.f32 1.0, %v1418_v18 }
 0x882   :  { %1419 = vrcp.f32 %v842_v19  ;;  %v854_v26 = vand.u32 2147483648, %v842_v19  ;;  %v852_v30 = vand.u32 2147483647, %v842_v19  ;;  %vm848_vm5 = vweird.f32 %v842_v19 }
 0x883   :  { %1421 = vrcp.f32 %v801_v20  ;;  %v813_v31 = vand.u32 2147483648, %v801_v20  ;;  %v811_v33 = vand.u32 2147483647, %v801_v20  ;;  %vm807_vm7 = vweird.f32 %v801_v20 }
 0x884   :  { %v855_v36 = vor.u32 1.1754944e-38, %v854_v26  ;;  %vm853_vm8 = vcmp.eq.f32.partialorder %v852_v30, 8.507059e+37 }
 0x885   :  { %v814_v40 = vor.u32 1.1754944e-38, %v813_v31  ;;  %vm812_vm10 = vcmp.eq.f32.partialorder %v811_v33, 8.507059e+37 }
 0x888   :  { %v1420_v21 = vpop.eup %1419 }
 0x889   :  { %v1422_v22 = vpop.eup %1421  ;;  %v844_v23 = vmul.f32 %v1420_v21, %v842_v19  ;;  %vm849_vm15 = vweird.f32 %v1420_v21 }
 0x88a   :  { %v803_v24 = vmul.f32 %v1422_v22, %v801_v20  ;;  %vm808_vm1 = vweird.f32 %v1422_v22  ;;  %vm850_vm6 = vmor %vm848_vm5, %vm849_vm15 }
 0x88b   :  { %v845_v25 = vsub.f32 1.0, %v844_v23  ;;  %vm809_vm9 = vmor %vm807_vm7, %vm808_vm1 }
 0x88c   :  { %v804_v27 = vsub.f32 1.0, %v803_v24 }
 0x88d   :  { %v846_v28 = vmul.f32 %v1420_v21, %v845_v25 }
 0x88e   :  { %v805_v32 = vmul.f32 %v1422_v22, %v804_v27 }
 0x88f   :  { %v847_v34 = vadd.f32 %v1420_v21, %v846_v28 }
 0x890   :  { %v806_v37 = vadd.f32 %v1422_v22, %v805_v32 }
 0x891   :  { %v851_v38 = vsel %vm850_vm6, %v1420_v21, %v847_v34 }
 0x892   :  { %v856_v41 = vsel %vm853_vm8, %v855_v36, %v851_v38  ;;  %v810_v42 = vsel %vm809_vm9, %v1422_v22, %v806_v37 }
 0x893   :  { %v861_v43 = vmul.f32 %v859_v35, %v856_v41  ;;  %v815_v45 = vsel %vm812_vm10, %v814_v40, %v810_v42  ;;  %v868_v52 = vsub.f32 1.0, %v856_v41  ;;  %v874_v54 = vmul.f32 0.0, %v856_v41 }
 0x894   :  { %v821_v46 = vmul.f32 %v819_v39, %v815_v45  ;;  %v828_v60 = vsub.f32 1.0, %v815_v45  ;;  %v834_v63 = vmul.f32 0.0, %v815_v45 }
 0x895   :  { %863 = vrot.lane.b32.xlu0 %v861_v43, %s1479_s9 }
 0x896   :  { %823 = vrot.lane.b32.xlu1 %v821_v46, %s1479_s9 }
 0x907   :  { %v864_v47 = vpop.permute.xlu0 %863 }
 0x908   :  { %v866_v48 = vadd.f32 %v864_v47, %v1799_v10  ;;  %v824_v49 = vpop.permute.xlu1 %823 }
 0x909   :  { %v826_v29 = vadd.f32 %v824_v49, %v1799_v10 }
 0x90a   :  { %1423 = vtanh.f32 %v866_v48 }
 0x90b   :  { %1425 = vtanh.f32 %v826_v29 }
 0x910   :  { %v1424_v50 = vpop.eup %1423 }
 0x911   :  { %v1426_v51 = vpop.eup %1425  ;;  %870 = vrot.lane.b32.xlu2 %v1424_v50, %s1480_s11 }
 0x912   :  { %830 = vrot.lane.b32.xlu0 %v1426_v51, %s1480_s11 }
 0x96b   :  { %v871_v53 = vpop.permute.xlu2 %870 }
 0x96c   :  { %v873_v57 = vmul.f32 %v871_v53, %v868_v52 }
 0x96e   :  { %v1809_v58 = vadd.f32 %v874_v54, %v873_v57 }
 0x970   :  { %v881_v59 = vrot.slane %v1809_v58, 4 }
 0x972   :  { %882 = vrot.lane.b32.xlu2 %v881_v59, %s1481_s3 }
 0x984   :  { %v831_v62 = vpop.permute.xlu0 %830 }
 0x985   :  { %v833_v44 = vmul.f32 %v831_v62, %v828_v60 }
 0x987   :  { %v1813_v0 = vadd.f32 %v834_v63, %v833_v44 }
 0x989   :  { %877 = vrot.lane.b32.xlu1 %v1813_v0, %s1480_s11 }
 0x9cc   :  { %v883_v1 = vpop.permute.xlu2 %882 }
 0x9fb   :  { %v878_v2 = vpop.permute.xlu1 %877 }
 0x9fc   :  { %v885_v56 = vsel %vm528_vm13, %v878_v2, %v883_v1 }
 0x9fd   :  { %v886_v3 = vpack.c.bf16 %v885_v56, %v885_v56  ;;  %v943_v17 = vrot.slane %v885_v56, 6 }
 0x9ff   :  { %1326 = vmatmul.msk.bf16.vlgmr.msrb.gmra.mxu3 %vm387_vm4, %v886_v3 }
 0xa82   :  { %v899_v11 = vpop.f32.mrf.mxu3 }
 0xa83   :  { %v900_v4 = vadd.f32 %v1791_v5, %v899_v11 }
 0xa85   :  { %v904_v6 = vrot.slane %v900_v4, 6 }
 0xa87   :  { %926 = vrot.lane.b32.xlu0 %v904_v6, %s1478_s24  ;;  %v906_v55 = vadd.f32 %v904_v6, %v1799_v10 }
 0xa89   :  { %v1327_v8 = vmul.f32 -1.442695, %v906_v55 }
 0xa8a   :  { %v901_v7 = vpop.f32.mrf.mxu3 }
 0xa8b   :  { %1427 = vpow2.f32 %v1327_v8 }
 0xa8f   :  { %944 = vrot.lane.b32.xlu0 %v943_v17, %s1482_s26 }
 0xa91   :  { %v1428_v9 = vpop.eup %1427 }
 0xa92   :  { %v910_v61 = vadd.f32 1.0, %v1428_v9 }
 0xa94   :  { %1429 = vrcp.f32 %v910_v61  ;;  %v922_v18 = vand.u32 2147483648, %v910_v61  ;;  %vm916_vm12 = vweird.f32 %v910_v61  ;;  %v920_v19 = vand.u32 2147483647, %v910_v61 }
 0xa96   :  { %v923_v21 = vor.u32 1.1754944e-38, %v922_v18  ;;  %vm921_vm15 = vcmp.eq.f32.partialorder %v920_v19, 8.507059e+37 }
 0xa9a   :  { %v1430_v12 = vpop.eup %1429 }
 0xa9b   :  { %v912_v13 = vmul.f32 %v1430_v12, %v910_v61  ;;  %vm917_vm11 = vweird.f32 %v1430_v12 }
 0xa9c   :  { %vm918_vm14 = vmor %vm916_vm12, %vm917_vm11 }
 0xa9d   :  { %v913_v14 = vsub.f32 1.0, %v912_v13 }
 0xa9f   :  { %v914_v15 = vmul.f32 %v1430_v12, %v913_v14 }
 0xaa1   :  { %v915_v16 = vadd.f32 %v1430_v12, %v914_v15 }
 0xaa3   :  { %v919_v20 = vsel %vm918_vm14, %v1430_v12, %v915_v16 }
 0xaa4   :  { %v924_v23 = vsel %vm921_vm15, %v923_v21, %v919_v20 }
 0xaa5   :  { %v936_v31 = vsub.f32 1.0, %v924_v23 }
 0xaf9   :  { %v927_v22 = vpop.permute.xlu0 %926 }
 0xafa   :  { %v929_v24 = vmul.f32 %v927_v22, %v924_v23 }
 0xafc   :  { %931 = vrot.lane.b32.xlu1 %v929_v24, %s1479_s9 }
 0xb01   :  { %v945_v28 = vpop.permute.xlu0 %944 }
 0xb02   :  { %v947_v33 = vmul.f32 %v945_v28, %v924_v23 }
 0xb04   :  { %949 = vrot.lane.b32.xlu1 %v943_v17, %s1483_s27 }
 0xb6e   :  { %v932_v25 = vpop.permute.xlu1 %931 }
 0xb6f   :  { %v934_v26 = vadd.f32 %v932_v25, %v1799_v10  ;;  %v1090_v25 = vld [vmem:[%s1925_s22] sm:$0x3] }
 0xb71   :  { %1431 = vtanh.f32 %v934_v26 }
 0xb76   :  { %v950_v30 = vpop.permute.xlu1 %949 }
 0xb77   :  { %v1432_v27 = vpop.eup %1431  ;;  %v952_v34 = vmul.f32 %v950_v30, %v924_v23 }
 0xb78   :  { %938 = vrot.lane.b32.xlu2 %v1432_v27, %s1480_s11 }
 0xbd2   :  { %v939_v32 = vpop.permute.xlu2 %938 }
 0xbd3   :  { %v941_v35 = vmul.f32 %v939_v32, %v936_v31 }
 0xbd5   :  { %v1827_v36 = vadd.f32 %v947_v33, %v941_v35  ;;  %v1829_v37 = vadd.f32 %v952_v34, %v941_v35 }
 0xbd7   :  { %955 = vrot.lane.b32.xlu2 %v1827_v36, %s1480_s11  ;;  %959 = vrot.lane.b32.xlu0 %v1829_v37, %s1481_s3 }
 0xc31   :  { %v956_v38 = vpop.permute.xlu2 %955 }
 0xc49   :  { %v960_v39 = vpop.permute.xlu0 %959 }
 0xc4a   :  { %v1836_v40 = vsel %vm528_vm13, %v956_v38, %v960_v39 }
 0xc4b   :  { %v963_v41 = vpack.c.bf16 %v1836_v40, %v1836_v40  ;;  %v1064_v16 = vrot.slane %v1836_v40, 2  ;;  %v1022_v24 = vrot.slane %v1836_v40, 6 }
 0xc4d   :  { %v965_v42 = vrot.slane %v963_v41, 1 }
 0xc4f   :  { %1328 = vmatmul.msk.bf16.vlgmr.msrb.gmra.mxu0 %vm387_vm4, %v965_v42  ;;  %v1070_v42 = vsel %vm126_vm0, %v1813_v0, %v1827_v36 }
 0xccc   :  { %v978_v43 = vpop.f32.mrf.mxu0 }
 0xccd   :  { %v979_v45 = vadd.f32 %v1791_v5, %v978_v43 }
 0xccf   :  { %1048 = vrot.lane.b32.xlu1 %v979_v45, %s1478_s24  ;;  %v983_v46 = vrot.slane %v979_v45, 4  ;;  %v1028_v51 = vadd.f32 %v979_v45, %v1799_v10  ;;  %v1135_v45 = vld [vmem:[%s1909_s18] sm:$0xf] }
 0xcd0   :  { %v1145_v0 = vsel %vm276_vm2, %v1135_v45, 0 }
 0xcd1   :  { %1005 = vrot.lane.b32.xlu2 %v983_v46, %s1478_s24  ;;  %v985_v48 = vadd.f32 %v983_v46, %v1799_v10  ;;  %v1330_v52 = vmul.f32 -1.442695, %v1028_v51  ;;  %1154 = vmatpush.bf16.msrb.mxu2 %v1145_v0 }
 0xcd3   :  { %v1329_v49 = vmul.f32 -1.442695, %v985_v48 }
 0xcd4   :  { %v980_v47 = vpop.f32.mrf.mxu0 }
 0xcd5   :  { %1433 = vpow2.f32 %v1329_v49 }
 0xcdb   :  { %v1434_v29 = vpop.eup %1433 }
 0xcdc   :  { %v989_v50 = vadd.f32 1.0, %v1434_v29 }
 0xcde   :  { %1435 = vrcp.f32 %v989_v50  ;;  %v1001_v63 = vand.u32 2147483648, %v989_v50  ;;  %vm995_vm5 = vweird.f32 %v989_v50  ;;  %v999_v44 = vand.u32 2147483647, %v989_v50 }
 0xcdf   :  { %1437 = vpow2.f32 %v1330_v52 }
 0xce0   :  { %v1002_v2 = vor.u32 1.1754944e-38, %v1001_v63  ;;  %vm1000_vm7 = vcmp.eq.f32.partialorder %v999_v44, 8.507059e+37  ;;  %v1384_v63 = vld [vmem:[%s1910_s19] ss:$0 sm:$0xff]  ;;  %s1188_s19 = sshll.u32 %s1911_s20, 4  ;;  %s1189_s19 = int_to_ptr.hbm [resolvable:$true] %s1188_s19 }
 0xce4   :  { %v1436_v53 = vpop.eup %1435 }
 0xce5   :  { %v991_v54 = vmul.f32 %v1436_v53, %v989_v50  ;;  %v1438_v57 = vpop.eup %1437  ;;  %vm996_vm1 = vweird.f32 %v1436_v53 }
 0xce6   :  { %v1032_v60 = vadd.f32 1.0, %v1438_v57  ;;  %vm997_vm6 = vmor %vm995_vm5, %vm996_vm1 }
 0xce7   :  { %v992_v5 = vsub.f32 1.0, %v991_v54  ;;  %v1383_v54 = vld [vmem:[%s1908_s17] ss:$0 sm:$0xff]  ;;  %s1484_s17 = smov [#allocation2]  }
 0xce8   :  { %1439 = vrcp.f32 %v1032_v60  ;;  %v1044_v8 = vand.u32 2147483648, %v1032_v60  ;;  %vm1038_vm9 = vweird.f32 %v1032_v60  ;;  %v1042_v9 = vand.u32 2147483647, %v1032_v60 }
 0xce9   :  { %v993_v59 = vmul.f32 %v1436_v53, %v992_v5 }
 0xcea   :  { %v1045_v12 = vor.u32 1.1754944e-38, %v1044_v8  ;;  %vm1043_vm11 = vcmp.eq.f32.partialorder %v1042_v9, 8.507059e+37 }
 0xceb   :  { %v994_v62 = vadd.f32 %v1436_v53, %v993_v59 }
 0xced   :  { %v998_v1 = vsel %vm997_vm6, %v1436_v53, %v994_v62 }
 0xcee   :  { %v1440_v56 = vpop.eup %1439  ;;  %v1003_v11 = vsel %vm1000_vm7, %v1002_v2, %v998_v1 }
 0xcef   :  { %v1034_v6 = vmul.f32 %v1440_v56, %v1032_v60  ;;  %vm1039_vm8 = vweird.f32 %v1440_v56  ;;  %v1015_v35 = vsub.f32 1.0, %v1003_v11 }
 0xcf0   :  { %vm1040_vm10 = vmor %vm1038_vm9, %vm1039_vm8 }
 0xcf1   :  { %v1035_v7 = vsub.f32 1.0, %v1034_v6 }
 0xcf3   :  { %v1036_v17 = vmul.f32 %v1440_v56, %v1035_v7 }
 0xcf5   :  { %v1037_v55 = vadd.f32 %v1440_v56, %v1036_v17 }
 0xcf7   :  { %v1041_v61 = vsel %vm1040_vm10, %v1440_v56, %v1037_v55 }
 0xcf8   :  { %v1046_v14 = vsel %vm1043_vm11, %v1045_v12, %v1041_v61 }
 0xcf9   :  { %v1058_v27 = vsub.f32 1.0, %v1046_v14 }
 0xd2b   :  { %v1006_v3 = vpop.permute.xlu2 %1005 }
 0xd2c   :  { %v1008_v4 = vmul.f32 %v1006_v3, %v1003_v11 }
 0xd2e   :  { %1010 = vrot.lane.b32.xlu1 %v1008_v4, %s1479_s9 }
 0xd41   :  { %v1049_v13 = vpop.permute.xlu1 %1048 }
 0xd42   :  { %v1051_v15 = vmul.f32 %v1049_v13, %v1046_v14 }
 0xd44   :  { %1053 = vrot.lane.b32.xlu0 %v1051_v15, %s1479_s9 }
 0xd4c   :  { %1065 = vrot.lane.b32.xlu0 %v1064_v16, %s1483_s27 }
 0xda0   :  { %v1011_v18 = vpop.permute.xlu1 %1010 }
 0xda1   :  { %v1013_v19 = vadd.f32 %v1011_v18, %v1799_v10 }
 0xda3   :  { %1441 = vtanh.f32 %v1013_v19 }
 0xda9   :  { %v1442_v20 = vpop.eup %1441 }
 0xdaa   :  { %1017 = vrot.lane.b32.xlu1 %v1442_v20, %s1480_s11 }
 0xdb6   :  { %v1054_v21 = vpop.permute.xlu0 %1053 }
 0xdb7   :  { %v1056_v22 = vadd.f32 %v1054_v21, %v1799_v10 }
 0xdb9   :  { %1443 = vtanh.f32 %v1056_v22 }
 0xdbe   :  { %v1066_v26 = vpop.permute.xlu0 %1065 }
 0xdbf   :  { %v1444_v23 = vpop.eup %1443  ;;  %v1068_v30 = vmul.f32 %v1066_v26, %v1046_v14 }
 0xdc0   :  { %1060 = vrot.lane.b32.xlu2 %v1444_v23, %s1480_s11 }
 0xdc8   :  { %1023 = vrot.lane.b32.xlu2 %v1022_v24, %s1482_s26 }
 0xdd0   :  { %1093 = vperm.xlu2 %1375, %v1090_v25  }
 0xe1a   :  { %v1061_v28 = vpop.permute.xlu2 %1060 }
 0xe1b   :  { %v1063_v31 = vmul.f32 %v1061_v28, %v1058_v27 }
 0xe1c   :  { %v1018_v33 = vpop.permute.xlu1 %1017 }
 0xe1d   :  { %v1069_v32 = vadd.f32 %v1068_v30, %v1063_v31  ;;  %v1020_v39 = vmul.f32 %v1018_v33, %v1015_v35 }
 0xe1f   :  { %v1072_v10 = vsel %vm126_vm0, %v1069_v32, %v1829_v37  ;;  %v1366_v37 = vld [vmem:[%s1907_s16 + $0x8] sm:$0xff] }
 0xe20   :  { %v1073_v34 = vsel %vm276_vm2, %v1072_v10, %v1809_v58  ;;  %1127 = vmatpush.bf16.msrb.mxu1 %v1366_v37  ;;  %v1365_v58 = vld [vmem:[%s1907_s16] sm:$0xff] }
 0xe21   :  { %1079 = vrot.lane.b32.xlu1 %v1073_v34, %s1481_s3  ;;  %s1186_s3 = sshll.u32 %s1484_s17, 4  ;;  %s1187_s3 = int_to_ptr.vmem [resolvable:$true] %s1186_s3 }
 0xe22   :  { %v1024_v38 = vpop.permute.xlu2 %1023 }
 0xe23   :  { %v1026_v40 = vmul.f32 %v1024_v38, %v1003_v11 }
 0xe24   :  { %1128 = vmatpush.bf16.msrb.mxu1 %v1365_v58 }
 0xe25   :  { %v1027_v41 = vadd.f32 %v1026_v40, %v1020_v39 }
 0xe27   :  { %v1071_v43 = vsel %vm276_vm2, %v1070_v42, %v1027_v41 }
 0xe28   :  { %1075 = vrot.lane.b32.xlu0 %v1071_v43, %s1480_s11 }
 0xe2a   :  { %v1094_v50 = vpop.permute.xlu2 %1093 }
 0xe93   :  { %v1080_v36 = vpop.permute.xlu1 %1079 }
 0xe9a   :  { %v1076_v46 = vpop.permute.xlu0 %1075 }
 0xe9b   :  { %v1082_v47 = vsel %vm528_vm13, %v1076_v46, %v1080_v36 }
 0xe9c   :  { %v1084_v48 = vrot.slane %v1082_v47, 2  ;;  %v1087_v29 = vrot.slane %v1082_v47, 4 }
 0xe9e   :  { %v1086_v49 = vadd.f32 %v1084_v48, %v1082_v47 }
 0xea0   :  { %v1089_v51 = vadd.f32 %v1087_v29, %v1086_v49 }
 0xea2   :  { %v1096_v52 = vmul.f32 %v1094_v50, %v1089_v51 }
 0xea4   :  { %v1101_v53 = vpack.c.bf16 %v1096_v52, %v1096_v52 }
 0xea6   :  { %1339 = vmatmul.msk.bf16.vlgmr.msrb.gmra.mxu1 %vm387_vm4, %v1101_v53  ;;  %vm1179_vm4 = vcmask 33792  }
 0xf23   :  { %v1130_v5 = vpop.f32.mrf.mxu1 }
 0xf24   :  { %v1131_v57 = vadd.f32 %v1383_v54, %v1130_v5 }
 0xf26   :  { %1445 = vtanh.f32 %v1131_v57 }
 0xf2b   :  { %v1132_v59 = vpop.f32.mrf.mxu1 }
 0xf2c   :  { %v1446_v60 = vpop.eup %1445 }
 0xf2d   :  { %v1136_v62 = vpack.c.bf16 %v1446_v60, %v1446_v60 }
 0xf2f   :  { %1340 = vmatmul.msk.bf16.vlgmr.msrb.gmra.mxu2 %vm272_vm3, %v1136_v62 }
 0xfb2   :  { %v1156_v44 = vpop.f32.mrf.mxu2 }
 0xfb3   :  { %v1157_v1 = vadd.f32 %v1384_v63, %v1156_v44 }
 0xfb5   :  { %v1341_v2 = vmul.f32 -1.442695, %v1157_v1 }
 0xfb7   :  { %1447 = vpow2.f32 %v1341_v2 }
 0xfba   :  { %v1158_v56 = vpop.f32.mrf.mxu2 }
 0xfbd   :  { %v1448_v3 = vpop.eup %1447 }
 0xfbe   :  { %v1163_v11 = vadd.f32 1.0, %v1448_v3 }
 0xfc0   :  { %1449 = vrcp.f32 %v1163_v11  ;;  %v1175_v17 = vand.u32 2147483648, %v1163_v11  ;;  %v1173_v8 = vand.u32 2147483647, %v1163_v11  ;;  %vm1169_vm2 = vweird.f32 %v1163_v11 }
 0xfc2   :  { %v1176_v61 = vor.u32 1.1754944e-38, %v1175_v17  ;;  %vm1174_vm13 = vcmp.eq.f32.partialorder %v1173_v8, 8.507059e+37 }
 0xfc6   :  { %v1450_v4 = vpop.eup %1449 }
 0xfc7   :  { %v1165_v6 = vmul.f32 %v1450_v4, %v1163_v11  ;;  %vm1170_vm0 = vweird.f32 %v1450_v4 }
 0xfc8   :  { %vm1171_vm3 = vmor %vm1169_vm2, %vm1170_vm0 }
 0xfc9   :  { %v1166_v7 = vsub.f32 1.0, %v1165_v6 }
 0xfcb   :  { %v1167_v55 = vmul.f32 %v1450_v4, %v1166_v7 }
 0xfcd   :  { %v1168_v9 = vadd.f32 %v1450_v4, %v1167_v55 }
 0xfcf   :  { %v1172_v12 = vsel %vm1171_vm3, %v1450_v4, %v1168_v9 }
 0xfd0   :  { %v1177_v13 = vsel %vm1174_vm13, %v1176_v61, %v1172_v12 }
 0xfd1   :  { %1180 = vst.msk [vmem:[#allocation2] sm:$0x3] %vm1179_vm4, %v1177_v13 }
 0xfd2   :  { %1191 = dma.vmem_to_hbm [thread:$0]  %s1187_s3, 32, %s1189_s19, [#allocation3]  }
 0xfd3   :  { %1475 = dma.done.wait [#allocation3], 32  }
 0xfd4   :  { %1476 = vsyncadd [#allocation3], 4294967264 }
 0xfd5   :  { %1196 = vsyncpa [#allocation3], 1 }

</bundles_post_ra>
